<compile_context>
chip_gen: v7x
topology: tpu7x:2x2x1
jax: 0.10.0
libtpu: 0.0.40
codegen_flags: <defaults>
</compile_context>

<pallas_src>
import functools

import jax
import jax.numpy as jnp
from jax.experimental import pallas as pl
from jax.experimental.pallas import tpu as pltpu


def _dilconv_kernel(x_ref, dw_ref, pw_ref, bias_ref, o_ref, *, K, dilation, stride):
    """Fused ReLU -> dilated depthwise KxK conv -> 1x1 pointwise conv (+ folded BN).

    x_ref   : (Hp, Wp, C_in)        spatially padded NHWC input, one batch element
                                    (real / unpadded channel count, storage dtype)
    dw_ref  : (K*K, C_in)           depthwise weights, row kh*K+kw = w[:, 0, kh, kw]
    pw_ref  : (C_in, C_out)         pointwise weights with BN scale folded in
    bias_ref: (1, C_out)            folded BN bias (f32)
    o_ref   : (TH, W_out, C_out)    one H_out tile of the output for this batch elem
    """
    TH, W_out, C_out = o_ref.shape
    C_in = x_ref.shape[2]

    # Rows of the (padded) input needed by this output H-tile (tile + halo).
    band_h = (TH - 1) * stride + dilation * (K - 1) + 1
    h_in_start = pl.program_id(1) * (TH * stride)

    # Load just the row band and apply ReLU once (avoids a full (Hp,Wp,C) temp).
    xb = jnp.maximum(x_ref[pl.ds(h_in_start, band_h), :, :].astype(jnp.float32), 0.0)

    # Dilated depthwise conv: K*K shifted multiply-accumulate taps (VPU work).
    acc = None
    for kh in range(K):
        for kw in range(K):
            if stride == 1:
                tap = xb[kh * dilation:kh * dilation + TH,
                         kw * dilation:kw * dilation + W_out, :]
            else:
                tap = jax.lax.slice(
                    xb,
                    (kh * dilation, kw * dilation, 0),
                    (kh * dilation + (TH - 1) * stride + 1,
                     kw * dilation + (W_out - 1) * stride + 1,
                     C_in),
                    (stride, stride, 1))                           # (TH, W_out, C_in)
            w_tap = dw_ref[kh * K + kw, :].astype(jnp.float32)     # (C_in,)
            term = tap * w_tap
            acc = term if acc is None else acc + term              # (TH, W_out, C_in)

    # 1x1 pointwise conv + folded BatchNorm bias.
    pw = pw_ref[...].astype(jnp.float32)                           # (C_in, C_out)
    bias = bias_ref[...].astype(jnp.float32)                       # (1, C_out)
    if C_in >= 32:
        # Big-channel path: one MXU matmul over the fused (TH*W_out) rows.
        out2d = jnp.dot(acc.reshape(TH * W_out, C_in), pw,
                        preferred_element_type=jnp.float32)
        out = (out2d + bias).reshape(TH, W_out, C_out)
    else:
        # Tiny-channel path (CIFAR DilConv): C_in broadcast-MACs on the VPU; avoids
        # an almost-empty (K=C_in) MXU pass and any in-kernel relayout.
        out = jnp.broadcast_to(bias.reshape(1, 1, C_out), (TH, W_out, C_out))
        for ci in range(C_in):
            out = out + acc[:, :, ci:ci + 1] * pw[ci:ci + 1, :]
    o_ref[...] = out.astype(o_ref.dtype)


def _pick_h_tile(H_out, W_out):
    """Largest divisor of H_out so that TH*W_out ~ 128 rows per step.

    Keeps the per-step matmul M reasonably sized while still producing several
    grid steps (pipelining depth / megacore sharding even at batch=2).
    """
    target = max(1, 128 // max(W_out, 1))
    th = 1
    for d in range(1, H_out + 1):
        if H_out % d == 0 and d <= target:
            th = d
    return th


def dilconv_forward_nhwc(x_nhwc, dw_weight, pw_weight, bn_gamma, bn_beta, bn_mean,
                         bn_var, *, stride=1, padding=2, dilation=2, eps=1e-5,
                         dw_mask=None, pw_mask=None,
                         storage_dtype=jnp.bfloat16, out_dtype=None, h_tile=None):
    """DilConv.forward on NHWC activations (preferred entry point)."""
    N, H, W, C_in = x_nhwc.shape
    C_out = pw_weight.shape[0]
    K = dw_weight.shape[-1]
    out_dtype = storage_dtype if out_dtype is None else out_dtype

    # MaskedConv2d: optional element-wise weight masks (trace-time weight math).
    if dw_mask is not None:
        dw_weight = dw_weight * dw_mask
    if pw_mask is not None:
        pw_weight = pw_weight * pw_mask

    H_out = (H + 2 * padding - dilation * (K - 1) - 1) // stride + 1
    W_out = (W + 2 * padding - dilation * (K - 1) - 1) // stride + 1
    Hp, Wp = H + 2 * padding, W + 2 * padding

    # Fold BatchNorm (inference mode, running stats) into the 1x1 conv.
    # TODO(synk): training-mode BN (batch statistics) would need an extra reduction pass.
    scale = (bn_gamma / jnp.sqrt(bn_var + eps)).astype(jnp.float32)   # (C_out,)
    shift = (bn_beta - bn_mean * scale).astype(jnp.float32)           # (C_out,)

    # Spatial zero-padding only; real channel count and bf16 storage through HBM.
    x_p = jnp.pad(x_nhwc.astype(storage_dtype),
                  ((0, 0), (padding, padding), (padding, padding), (0, 0)))

    # Depthwise weights (C_in, 1, K, K) -> (K*K, C_in).
    dw = jnp.transpose(dw_weight[:, 0, :, :], (1, 2, 0)).reshape(K * K, C_in)
    dw = dw.astype(storage_dtype)

    # Pointwise weights (C_out, C_in, 1, 1) -> (C_in, C_out) with BN scale folded.
    pw = (jnp.transpose(pw_weight[:, :, 0, 0], (1, 0)).astype(jnp.float32)
          * scale[None, :]).astype(storage_dtype)
    bias = shift.reshape(1, C_out)                                    # f32

    TH = _pick_h_tile(H_out, W_out) if h_tile is None else h_tile
    assert H_out % TH == 0, f"h_tile {TH} must divide H_out {H_out}"
    n_h = H_out // TH

    kernel = functools.partial(_dilconv_kernel, K=K, dilation=dilation, stride=stride)

    return pl.pallas_call(
        kernel,
        out_shape=jax.ShapeDtypeStruct((N, H_out, W_out, C_out), out_dtype),
        grid_spec=pltpu.PrefetchScalarGridSpec(
            num_scalar_prefetch=0,
            grid=(N, n_h),
            in_specs=[
                # Whole padded image for batch n; constant block index across the
                # H-tile axis -> fetched once per batch element (tiny at real C).
                # TODO(synk): for very large H, switch to a manual halo DMA so the
                # input is also H-tiled instead of whole-(Hp,Wp) resident.
                pl.BlockSpec((None, Hp, Wp, C_in), lambda n, h: (n, 0, 0, 0)),
                pl.BlockSpec((K * K, C_in), lambda n, h: (0, 0)),
                pl.BlockSpec((C_in, C_out), lambda n, h: (0, 0)),
                pl.BlockSpec((1, C_out), lambda n, h: (0, 0)),
            ],
            out_specs=pl.BlockSpec((None, TH, W_out, C_out),
                                   lambda n, h: (n, h, 0, 0)),
        ),
        compiler_params=pltpu.CompilerParams(
            dimension_semantics=("parallel", "parallel"),
            vmem_limit_bytes=32 * 1024 * 1024,
        ),
    )(x_p, dw, pw, bias)


def dilconv_forward(x, dw_weight, pw_weight, bn_gamma, bn_beta, bn_mean, bn_var, *,
                    stride=1, padding=2, dilation=2, eps=1e-5,
                    dw_mask=None, pw_mask=None,
                    storage_dtype=jnp.bfloat16, h_tile=None):
    """NCHW convenience wrapper (PyTorch convention): NCHW in -> NCHW out.

    TODO(synk): in a full network, keep activations NHWC end-to-end and call
    dilconv_forward_nhwc directly so this transpose pair disappears per layer.
    """
    x_nhwc = jnp.transpose(x, (0, 2, 3, 1))
    y_nhwc = dilconv_forward_nhwc(
        x_nhwc, dw_weight, pw_weight, bn_gamma, bn_beta, bn_mean, bn_var,
        stride=stride, padding=padding, dilation=dilation, eps=eps,
        dw_mask=dw_mask, pw_mask=pw_mask,
        storage_dtype=storage_dtype, h_tile=h_tile)
    return jnp.transpose(y_nhwc, (0, 3, 1, 2)).astype(x.dtype)


def _ref_dilconv(x, dw_weight, pw_weight, gamma, beta, mean, var,
                 *, stride, padding, dilation, eps=1e-5):
    """Pure-JAX f32 reference (lax convolutions) for correctness checking."""
    y = jnp.maximum(x, 0.0)
    y = jax.lax.conv_general_dilated(
        y, dw_weight, window_strides=(stride, stride),
        padding=((padding, padding), (padding, padding)),
        rhs_dilation=(dilation, dilation),
        dimension_numbers=("NCHW", "OIHW", "NCHW"),
        feature_group_count=x.shape[1])
    y = jax.lax.conv_general_dilated(
        y, pw_weight, window_strides=(1, 1), padding="VALID",
        dimension_numbers=("NCHW", "OIHW", "NCHW"))
    scale = gamma / jnp.sqrt(var + eps)
    shift = beta - mean * scale
    return y * scale[None, :, None, None] + shift[None, :, None, None]


if __name__ == "__main__":
    key = jax.random.PRNGKey(0)
    ks = jax.random.split(key, 9)

    # Small CIFAR-style DilConv_3x3: kernel=3, stride=1, padding=2, dilation=2.
    N, C_in, H, W = 2, 4, 16, 16
    C_out = 8
    K, stride, dilation, padding = 3, 1, 2, 2

    x = jax.random.normal(ks[0], (N, C_in, H, W), jnp.float32)
    dw_w = 0.3 * jax.random.normal(ks[1], (C_in, 1, K, K), jnp.float32)
    pw_w = 0.3 * jax.random.normal(ks[2], (C_out, C_in, 1, 1), jnp.float32)
    gamma = 1.0 + 0.1 * jax.random.normal(ks[3], (C_out,), jnp.float32)
    beta = 0.1 * jax.random.normal(ks[4], (C_out,), jnp.float32)
    mean = 0.1 * jax.random.normal(ks[5], (C_out,), jnp.float32)
    var = jax.random.uniform(ks[6], (C_out,), dtype=jnp.float32, minval=0.5, maxval=1.5)
    # MaskedConv2d weight masks (the forward path the module actually exercises).
    dw_mask = (jax.random.uniform(ks[7], dw_w.shape) > 0.3).astype(jnp.float32)
    pw_mask = (jax.random.uniform(ks[8], pw_w.shape) > 0.3).astype(jnp.float32)

    y = dilconv_forward(x, dw_w, pw_w, gamma, beta, mean, var,
                        stride=stride, padding=padding, dilation=dilation,
                        dw_mask=dw_mask, pw_mask=pw_mask)
    y = jax.block_until_ready(y)

    y_ref = _ref_dilconv(x, dw_w * dw_mask, pw_w * pw_mask, gamma, beta, mean, var,
                         stride=stride, padding=padding, dilation=dilation)

    assert y.shape == (N, C_out, H, W), y.shape
    assert y.dtype == x.dtype
    # bf16 storage through HBM -> relative + absolute tolerance.
    max_err = float(jnp.max(jnp.abs(y - y_ref)))
    ok = bool(jnp.all(jnp.abs(y - y_ref) <= 5e-2 + 2e-2 * jnp.abs(y_ref)))
    assert ok, f"mismatch: max abs error {max_err}"
    print("KERNEL_OK")
</pallas_src>

<mosaic_0001>
module attributes {stable_mosaic.version = 11 : i64} {
  func.func @_dilconv_kernel(%arg0: i32, %arg1: i32, %arg2: memref<1x20x20x4xbf16, #tpu.memory_space<vmem>>, %arg3: memref<9x4xbf16, #tpu.memory_space<vmem>>, %arg4: memref<4x8xbf16, #tpu.memory_space<vmem>>, %arg5: memref<1x8xf32, #tpu.memory_space<vmem>>, %arg6: memref<1x8x16x8xbf16, #tpu.memory_space<vmem>>) attributes {dimension_semantics = [#tpu.dimension_semantics<parallel>, #tpu.dimension_semantics<parallel>], iteration_bounds = array<i64: 2, 2>, scalar_prefetch = 0 : i64, scratch_operands = 0 : i64, tpu.core_type = #tpu.core_type<tc>, window_params = [{transform_indices = @transform_0, window_bounds = array<i64: 1, 20, 20, 4>}, {pipeline_mode = #tpu.pipeline_mode<synchronous>, transform_indices = @transform_1, window_bounds = array<i64: 9, 4>}, {pipeline_mode = #tpu.pipeline_mode<synchronous>, transform_indices = @transform_2, window_bounds = array<i64: 4, 8>}, {pipeline_mode = #tpu.pipeline_mode<synchronous>, transform_indices = @transform_3, window_bounds = array<i64: 1, 8>}, {transform_indices = @transform_4, window_bounds = array<i64: 1, 8, 16, 8>}]} {
    %c8_i32 = arith.constant 8 : i32
    %0 = arith.muli %arg1, %c8_i32 : i32
    %c0 = arith.constant 0 : index
    %1 = arith.index_cast %0 : i32 to index
    %c0_0 = arith.constant 0 : index
    %c0_1 = arith.constant 0 : index
    %2 = vector.load %arg2[%c0, %1, %c0_0, %c0_1] : memref<1x20x20x4xbf16, #tpu.memory_space<vmem>>, vector<1x12x20x4xbf16>
    %3 = vector.shape_cast %2 : vector<1x12x20x4xbf16> to vector<12x20x4xbf16>
    %4 = arith.extf %3 : vector<12x20x4xbf16> to vector<12x20x4xf32>
    %cst = arith.constant 0.000000e+00 : f32
    %5 = vector.broadcast %cst : f32 to vector<12x20x4xf32>
    %6 = arith.maximumf %4, %5 : vector<12x20x4xf32>
    %7 = vector.extract_strided_slice %6 {offsets = [0, 0, 0], sizes = [8, 16, 4], strides = [1, 1, 1]} : vector<12x20x4xf32> to vector<8x16x4xf32>
    %c0_2 = arith.constant 0 : index
    %c0_3 = arith.constant 0 : index
    %8 = vector.load %arg3[%c0_2, %c0_3] : memref<9x4xbf16, #tpu.memory_space<vmem>>, vector<1x4xbf16>
    %9 = vector.shape_cast %8 : vector<1x4xbf16> to vector<4xbf16>
    %10 = arith.extf %9 : vector<4xbf16> to vector<4xf32>
    %11 = vector.shape_cast %10 : vector<4xf32> to vector<1x1x4xf32>
    %12 = vector.broadcast %11 : vector<1x1x4xf32> to vector<8x16x4xf32>
    %13 = arith.mulf %7, %12 : vector<8x16x4xf32>
    %14 = vector.extract_strided_slice %6 {offsets = [0, 2, 0], sizes = [8, 16, 4], strides = [1, 1, 1]} : vector<12x20x4xf32> to vector<8x16x4xf32>
    %c1 = arith.constant 1 : index
    %c0_4 = arith.constant 0 : index
    %15 = vector.load %arg3[%c1, %c0_4] : memref<9x4xbf16, #tpu.memory_space<vmem>>, vector<1x4xbf16>
    %16 = vector.shape_cast %15 : vector<1x4xbf16> to vector<4xbf16>
    %17 = arith.extf %16 : vector<4xbf16> to vector<4xf32>
    %18 = vector.shape_cast %17 : vector<4xf32> to vector<1x1x4xf32>
    %19 = vector.broadcast %18 : vector<1x1x4xf32> to vector<8x16x4xf32>
    %20 = arith.mulf %14, %19 : vector<8x16x4xf32>
    %21 = arith.addf %13, %20 : vector<8x16x4xf32>
    %22 = vector.extract_strided_slice %6 {offsets = [0, 4, 0], sizes = [8, 16, 4], strides = [1, 1, 1]} : vector<12x20x4xf32> to vector<8x16x4xf32>
    %c2 = arith.constant 2 : index
    %c0_5 = arith.constant 0 : index
    %23 = vector.load %arg3[%c2, %c0_5] : memref<9x4xbf16, #tpu.memory_space<vmem>>, vector<1x4xbf16>
    %24 = vector.shape_cast %23 : vector<1x4xbf16> to vector<4xbf16>
    %25 = arith.extf %24 : vector<4xbf16> to vector<4xf32>
    %26 = vector.shape_cast %25 : vector<4xf32> to vector<1x1x4xf32>
    %27 = vector.broadcast %26 : vector<1x1x4xf32> to vector<8x16x4xf32>
    %28 = arith.mulf %22, %27 : vector<8x16x4xf32>
    %29 = arith.addf %21, %28 : vector<8x16x4xf32>
    %30 = vector.extract_strided_slice %6 {offsets = [2, 0, 0], sizes = [8, 16, 4], strides = [1, 1, 1]} : vector<12x20x4xf32> to vector<8x16x4xf32>
    %c3 = arith.constant 3 : index
    %c0_6 = arith.constant 0 : index
    %31 = vector.load %arg3[%c3, %c0_6] : memref<9x4xbf16, #tpu.memory_space<vmem>>, vector<1x4xbf16>
    %32 = vector.shape_cast %31 : vector<1x4xbf16> to vector<4xbf16>
    %33 = arith.extf %32 : vector<4xbf16> to vector<4xf32>
    %34 = vector.shape_cast %33 : vector<4xf32> to vector<1x1x4xf32>
    %35 = vector.broadcast %34 : vector<1x1x4xf32> to vector<8x16x4xf32>
    %36 = arith.mulf %30, %35 : vector<8x16x4xf32>
    %37 = arith.addf %29, %36 : vector<8x16x4xf32>
    %38 = vector.extract_strided_slice %6 {offsets = [2, 2, 0], sizes = [8, 16, 4], strides = [1, 1, 1]} : vector<12x20x4xf32> to vector<8x16x4xf32>
    %c4 = arith.constant 4 : index
    %c0_7 = arith.constant 0 : index
    %39 = vector.load %arg3[%c4, %c0_7] : memref<9x4xbf16, #tpu.memory_space<vmem>>, vector<1x4xbf16>
    %40 = vector.shape_cast %39 : vector<1x4xbf16> to vector<4xbf16>
    %41 = arith.extf %40 : vector<4xbf16> to vector<4xf32>
    %42 = vector.shape_cast %41 : vector<4xf32> to vector<1x1x4xf32>
    %43 = vector.broadcast %42 : vector<1x1x4xf32> to vector<8x16x4xf32>
    %44 = arith.mulf %38, %43 : vector<8x16x4xf32>
    %45 = arith.addf %37, %44 : vector<8x16x4xf32>
    %46 = vector.extract_strided_slice %6 {offsets = [2, 4, 0], sizes = [8, 16, 4], strides = [1, 1, 1]} : vector<12x20x4xf32> to vector<8x16x4xf32>
    %c5 = arith.constant 5 : index
    %c0_8 = arith.constant 0 : index
    %47 = vector.load %arg3[%c5, %c0_8] : memref<9x4xbf16, #tpu.memory_space<vmem>>, vector<1x4xbf16>
    %48 = vector.shape_cast %47 : vector<1x4xbf16> to vector<4xbf16>
    %49 = arith.extf %48 : vector<4xbf16> to vector<4xf32>
    %50 = vector.shape_cast %49 : vector<4xf32> to vector<1x1x4xf32>
    %51 = vector.broadcast %50 : vector<1x1x4xf32> to vector<8x16x4xf32>
    %52 = arith.mulf %46, %51 : vector<8x16x4xf32>
    %53 = arith.addf %45, %52 : vector<8x16x4xf32>
    %54 = vector.extract_strided_slice %6 {offsets = [4, 0, 0], sizes = [8, 16, 4], strides = [1, 1, 1]} : vector<12x20x4xf32> to vector<8x16x4xf32>
    %c6 = arith.constant 6 : index
    %c0_9 = arith.constant 0 : index
    %55 = vector.load %arg3[%c6, %c0_9] : memref<9x4xbf16, #tpu.memory_space<vmem>>, vector<1x4xbf16>
    %56 = vector.shape_cast %55 : vector<1x4xbf16> to vector<4xbf16>
    %57 = arith.extf %56 : vector<4xbf16> to vector<4xf32>
    %58 = vector.shape_cast %57 : vector<4xf32> to vector<1x1x4xf32>
    %59 = vector.broadcast %58 : vector<1x1x4xf32> to vector<8x16x4xf32>
    %60 = arith.mulf %54, %59 : vector<8x16x4xf32>
    %61 = arith.addf %53, %60 : vector<8x16x4xf32>
    %62 = vector.extract_strided_slice %6 {offsets = [4, 2, 0], sizes = [8, 16, 4], strides = [1, 1, 1]} : vector<12x20x4xf32> to vector<8x16x4xf32>
    %c7 = arith.constant 7 : index
    %c0_10 = arith.constant 0 : index
    %63 = vector.load %arg3[%c7, %c0_10] : memref<9x4xbf16, #tpu.memory_space<vmem>>, vector<1x4xbf16>
    %64 = vector.shape_cast %63 : vector<1x4xbf16> to vector<4xbf16>
    %65 = arith.extf %64 : vector<4xbf16> to vector<4xf32>
    %66 = vector.shape_cast %65 : vector<4xf32> to vector<1x1x4xf32>
    %67 = vector.broadcast %66 : vector<1x1x4xf32> to vector<8x16x4xf32>
    %68 = arith.mulf %62, %67 : vector<8x16x4xf32>
    %69 = arith.addf %61, %68 : vector<8x16x4xf32>
    %70 = vector.extract_strided_slice %6 {offsets = [4, 4, 0], sizes = [8, 16, 4], strides = [1, 1, 1]} : vector<12x20x4xf32> to vector<8x16x4xf32>
    %c8 = arith.constant 8 : index
    %c0_11 = arith.constant 0 : index
    %71 = vector.load %arg3[%c8, %c0_11] : memref<9x4xbf16, #tpu.memory_space<vmem>>, vector<1x4xbf16>
    %72 = vector.shape_cast %71 : vector<1x4xbf16> to vector<4xbf16>
    %73 = arith.extf %72 : vector<4xbf16> to vector<4xf32>
    %74 = vector.shape_cast %73 : vector<4xf32> to vector<1x1x4xf32>
    %75 = vector.broadcast %74 : vector<1x1x4xf32> to vector<8x16x4xf32>
    %76 = arith.mulf %70, %75 : vector<8x16x4xf32>
    %77 = arith.addf %69, %76 : vector<8x16x4xf32>
    %c0_12 = arith.constant 0 : index
    %c0_13 = arith.constant 0 : index
    %78 = vector.load %arg4[%c0_12, %c0_13] : memref<4x8xbf16, #tpu.memory_space<vmem>>, vector<4x8xbf16>
    %79 = arith.extf %78 : vector<4x8xbf16> to vector<4x8xf32>
    %c0_14 = arith.constant 0 : index
    %c0_15 = arith.constant 0 : index
    %80 = vector.load %arg5[%c0_14, %c0_15] : memref<1x8xf32, #tpu.memory_space<vmem>>, vector<1x8xf32>
    %81 = vector.shape_cast %80 : vector<1x8xf32> to vector<1x1x8xf32>
    %82 = vector.shape_cast %81 : vector<1x1x8xf32> to vector<1x1x8xf32>
    %83 = vector.broadcast %82 : vector<1x1x8xf32> to vector<8x16x8xf32>
    %84 = vector.extract_strided_slice %77 {offsets = [0, 0, 0], sizes = [8, 16, 1], strides = [1, 1, 1]} : vector<8x16x4xf32> to vector<8x16x1xf32>
    %85 = vector.extract_strided_slice %79 {offsets = [0, 0], sizes = [1, 8], strides = [1, 1]} : vector<4x8xf32> to vector<1x8xf32>
    %86 = vector.shape_cast %85 : vector<1x8xf32> to vector<1x1x8xf32>
    %87 = vector.broadcast %84 : vector<8x16x1xf32> to vector<8x16x8xf32>
    %88 = vector.broadcast %86 : vector<1x1x8xf32> to vector<8x16x8xf32>
    %89 = arith.mulf %87, %88 : vector<8x16x8xf32>
    %90 = arith.addf %83, %89 : vector<8x16x8xf32>
    %91 = vector.extract_strided_slice %77 {offsets = [0, 0, 1], sizes = [8, 16, 1], strides = [1, 1, 1]} : vector<8x16x4xf32> to vector<8x16x1xf32>
    %92 = vector.extract_strided_slice %79 {offsets = [1, 0], sizes = [1, 8], strides = [1, 1]} : vector<4x8xf32> to vector<1x8xf32>
    %93 = vector.shape_cast %92 : vector<1x8xf32> to vector<1x1x8xf32>
    %94 = vector.broadcast %91 : vector<8x16x1xf32> to vector<8x16x8xf32>
    %95 = vector.broadcast %93 : vector<1x1x8xf32> to vector<8x16x8xf32>
    %96 = arith.mulf %94, %95 : vector<8x16x8xf32>
    %97 = arith.addf %90, %96 : vector<8x16x8xf32>
    %98 = vector.extract_strided_slice %77 {offsets = [0, 0, 2], sizes = [8, 16, 1], strides = [1, 1, 1]} : vector<8x16x4xf32> to vector<8x16x1xf32>
    %99 = vector.extract_strided_slice %79 {offsets = [2, 0], sizes = [1, 8], strides = [1, 1]} : vector<4x8xf32> to vector<1x8xf32>
    %100 = vector.shape_cast %99 : vector<1x8xf32> to vector<1x1x8xf32>
    %101 = vector.broadcast %98 : vector<8x16x1xf32> to vector<8x16x8xf32>
    %102 = vector.broadcast %100 : vector<1x1x8xf32> to vector<8x16x8xf32>
    %103 = arith.mulf %101, %102 : vector<8x16x8xf32>
    %104 = arith.addf %97, %103 : vector<8x16x8xf32>
    %105 = vector.extract_strided_slice %77 {offsets = [0, 0, 3], sizes = [8, 16, 1], strides = [1, 1, 1]} : vector<8x16x4xf32> to vector<8x16x1xf32>
    %106 = vector.extract_strided_slice %79 {offsets = [3, 0], sizes = [1, 8], strides = [1, 1]} : vector<4x8xf32> to vector<1x8xf32>
    %107 = vector.shape_cast %106 : vector<1x8xf32> to vector<1x1x8xf32>
    %108 = vector.broadcast %105 : vector<8x16x1xf32> to vector<8x16x8xf32>
    %109 = vector.broadcast %107 : vector<1x1x8xf32> to vector<8x16x8xf32>
    %110 = arith.mulf %108, %109 : vector<8x16x8xf32>
    %111 = arith.addf %104, %110 : vector<8x16x8xf32>
    %112 = arith.truncf %111 : vector<8x16x8xf32> to vector<8x16x8xbf16>
    %c0_16 = arith.constant 0 : index
    %c0_17 = arith.constant 0 : index
    %c0_18 = arith.constant 0 : index
    %c0_19 = arith.constant 0 : index
    %113 = vector.load %arg6[%c0_16, %c0_17, %c0_18, %c0_19] : memref<1x8x16x8xbf16, #tpu.memory_space<vmem>>, vector<1x8x16x8xbf16>
    %114 = vector.shape_cast %113 : vector<1x8x16x8xbf16> to vector<8x16x8xbf16>
    %115 = vector.shape_cast %112 : vector<8x16x8xbf16> to vector<1x8x16x8xbf16>
    tpu.vector_store %arg6[%c0_16, %c0_17, %c0_18, %c0_19], %115 {strides = array<i32>} : memref<1x8x16x8xbf16, #tpu.memory_space<vmem>>, vector<1x8x16x8xbf16>,
    return
  }
  func.func @transform_0(%arg0: i32, %arg1: i32) -> (i32, i32, i32, i32) {
    %c0_i32 = arith.constant 0 : i32
    %c0_i32_0 = arith.constant 0 : i32
    %c0_i32_1 = arith.constant 0 : i32
    %c0_i32_2 = arith.constant 0 : i32
    return %arg0, %c0_i32, %c0_i32_0, %c0_i32_1 : i32, i32, i32, i32
  }
  func.func @transform_1(%arg0: i32, %arg1: i32) -> (i32, i32) {
    %c0_i32 = arith.constant 0 : i32
    %c0_i32_0 = arith.constant 0 : i32
    %c0_i32_1 = arith.constant 0 : i32
    return %c0_i32, %c0_i32_0 : i32, i32
  }
  func.func @transform_2(%arg0: i32, %arg1: i32) -> (i32, i32) {
    %c0_i32 = arith.constant 0 : i32
    %c0_i32_0 = arith.constant 0 : i32
    %c0_i32_1 = arith.constant 0 : i32
    return %c0_i32, %c0_i32_0 : i32, i32
  }
  func.func @transform_3(%arg0: i32, %arg1: i32) -> (i32, i32) {
    %c0_i32 = arith.constant 0 : i32
    %c0_i32_0 = arith.constant 0 : i32
    %c0_i32_1 = arith.constant 0 : i32
    return %c0_i32, %c0_i32_0 : i32, i32
  }
  func.func @transform_4(%arg0: i32, %arg1: i32) -> (i32, i32, i32, i32) {
    %c0_i32 = arith.constant 0 : i32
    %c0_i32_0 = arith.constant 0 : i32
    %c0_i32_1 = arith.constant 0 : i32
    return %arg0, %arg1, %c0_i32, %c0_i32_0 : i32, i32, i32, i32
  }
}

</mosaic_0001>

<bundles_post_ra>
// kernel: tpu_custom_call.1
= control target key start
LH: loop header
LB: loop body
LE: loop exit
PB: predicated region body
PF: predicated region fallthrough
CT: control target
= control target key end

     0   :  { %s1981_s15 = smov 0   ;;  %s1983_s16 = smov 0   ;;  %s3118_s0 = inlined_call_operand.vmem [shape: bf16[2,20,20,4], index: 0, kind: input, shape index: {}]   ;;  %s3119_s1 = inlined_call_operand.vmem [shape: bf16[9,4], index: 1, kind: input, shape index: {}]   ;;  %s3120_s2 = inlined_call_operand.vmem [shape: bf16[4,8], index: 2, kind: input, shape index: {}]   ;;  %s3121_s3 = inlined_call_operand.vmem [shape: f32[1,8], index: 3, kind: input, shape index: {}]   ;;  %s3122_s4 = inlined_call_operand.vmem [shape: bf16[2,16,16,8], index: 4, kind: output, shape index: {}]  }
   0x1   :  { %s1985_s17 = smov 0   ;;  %s1987_s18 = smov 0  }
   0x2   :  { %s1989_s19 = smov 0  }
   0x3 LB: > { %s23_s20 = sadd.s32 1, %s1942_s17  ;;  %s26_s21 = sadd.s32 1, %s1946_s18  ;;  %s1950_s19 = sphi %s1989_s19, %s14_s19   ;;  %s1946_s18 = sphi %s1987_s18, %s3146_s18   ;;  %s1942_s17 = sphi %s1985_s17, %s3145_s17   ;;  %s1938_s16 = sphi %s1983_s16, %s3144_s16   ;;  %s1934_s15 = sphi %s1981_s15, %s3143_s15  }
   0x4   : > { %p24_p0 = scmp.ge.s32.totalorder %s23_s20, 2  ;;  %p1785_p1 = scmp.ge.s32.totalorder %s1950_s19, 1 }
   0x5   : > { %p176_p2 = scmp.lt.s32.totalorder %s1950_s19, 5 }
   0x6   : > { %s3148_s20 = smov (%p24_p0, %s23_s20), 0  ;;  %s3150_s21 = smov (!%p24_p0, %s26_s21), %s1946_s18 }
   0x7   : > { %p177_p3 = pnand %p1785_p1, %p176_p2  ;;  %p28_p4 = scmp.ge.s32.totalorder %s3150_s21, 2 }
   0x8   : > { %p207_p5 = scmp.lt.s32.totalorder (!%p177_p3), %s1938_s16, 1  ;;  %v335_v0 = vld [vmem:[%s3119_s1] sm:$0x1] (!%p177_p3)  ;;  %v337_v1 = vlaneseq (!%p177_p3)  ;;  %v1952_v2 = vmov (!%p177_p3), 0   ;;  %v482_v3 = vld [vmem:[%s3119_s1] sm:$0x2] (!%p177_p3) }
   0x9   : > { %s3152_s21 = smov (%p28_p4, %s3150_s21), 0  ;;  %180 = sbr.rel (%p177_p3) target bundleno = 423 (0x1a7), region = 36 }
   0xa   : > { %1905 = vset.pattern.permute.xlu1 (!%p177_p3), %v1952_v2  ;;  %1904 = vset.pattern.permute.xlu0 (!%p177_p3), %v1952_v2  ;;  %v645_v4 = vld [vmem:[%s3119_s1] sm:$0x4] (!%p177_p3)  ;;  %v2024_v5 = vshrl.u32 (!%p177_p3), %v337_v1, 7  ;;  %v895_v6 = vld [vmem:[%s3119_s1] sm:$0x8] (!%p177_p3)  ;;  %s1813_s30 = smul.u32 (!%p177_p3), 96, %s1934_s15  ;;  %v336_v7 = vunpack.c.l.bf16 (!%p177_p3), %v335_v0  ;;  %v483_v8 = vunpack.c.l.bf16 (!%p177_p3), %v482_v3 }
   0xb   : > { %v646_v9 = vunpack.c.l.bf16 (!%p177_p3), %v645_v4  ;;  %v896_v10 = vunpack.c.l.bf16 (!%p177_p3), %v895_v6  ;;  %v1057_v11 = vld [vmem:[%s3119_s1 + $0x4] sm:$0x1] (!%p177_p3)  ;;  %vm409_vm0 = vcmask (!%p177_p3), 1045504   ;;  %vm536_vm1 = vcmask (!%p177_p3), 1043456   ;;  %s1787_s23 = sshll.u32 (!%p177_p3), %s1934_s15, 3 }
   0xc   : > { %v2035_v12 = vsub.s32 (!%p177_p3), 0, %v2024_v5  ;;  %v3125_v13 = vsub.s32 (!%p177_p3), 1, %v2024_v5  ;;  %v3124_v14 = vsub.s32 (!%p177_p3), 2, %v2024_v5  ;;  %v3123_v15 = vsub.s32 (!%p177_p3), 3, %v2024_v5  ;;  %p215_p6 = scmp.lt.s32.totalorder (!%p177_p3), %s1787_s23, 15 }
   0xd   : > { %v649_v16 = vsub.s32 (!%p177_p3), 4, %v2024_v5  ;;  %v773_v17 = vsub.s32 (!%p177_p3), 5, %v2024_v5  ;;  %v899_v18 = vsub.s32 (!%p177_p3), 6, %v2024_v5  ;;  %v935_v19 = vsub.s32 (!%p177_p3), 7, %v2024_v5 }
   0xe   : > { %v1058_v20 = vunpack.c.l.bf16 (!%p177_p3), %v1057_v11  ;;  %v2050_v21 = vrot.slane (!%p177_p3), %v336_v7, %v2035_v12  ;;  %v2054_v22 = vrot.slane (!%p177_p3), %v336_v7, %v3125_v13  ;;  %v2058_v23 = vrot.slane (!%p177_p3), %v483_v8, %v3124_v14 }
   0xf   : > { %v2065_v27 = vrot.slane (!%p177_p3), %v483_v8, %v3123_v15  ;;  %v2067_v28 = vrot.slane (!%p177_p3), %v646_v9, %v649_v16  ;;  %v2069_v29 = vrot.slane (!%p177_p3), %v646_v9, %v773_v17  ;;  %v2071_v30 = vrot.slane (!%p177_p3), %v896_v10, %v899_v18 }
  0x10   : > { %s3154_s16 = smov (!%p207_p5, %s1938_s16), 1  ;;  %v2074_v38 = vrot.slane %v896_v10, %v935_v19  ;;  %v2077_v39 = vrot.slane %v1058_v20, %v2035_v12  ;;  %s3156_s23 = smov (!%p215_p6, %s1787_s23), 15  ;;  %vm1672_vm2 = vcmask 60416  }
  0x11   : > { %s1859_s7 = smul.u32 240, %s3154_s16  ;;  %s1788_s15 = sshll.u32 %s3156_s23, 1 }
  0x12   : > { %s1789_s24 = sshll.u32 %s3154_s16, 5 }
  0x13   : > { %s211_s10 = scalar_lea.vmem %s3118_s0, %s1859_s7  ;;  %s219_s25 = sadd.s32 %s1789_s24, %s1788_s15 }
  0x14   : > { %s2047_s11 = scalar_lea.vmem %s211_s10, %s1813_s30  ;;  %s1790_s16 = sshll.u32 %s219_s25, 2 }
  0x15   : > { %v230_v24 = vld [vmem:[%s2047_s11 + $0xc] sm:$0xff]   ;;  %v236_v25 = vld [vmem:[%s2047_s11 + $0x24] sm:$0xff]   ;;  %v242_v26 = vld [vmem:[%s2047_s11 + $0x3c] sm:$0xff]   ;;  %s3008_s28 = scalar_lea.vmem %s3122_s4, %s1790_s16 }
  0x16   : > { %v266_v31 = vunpack.c.l.bf16 %v230_v24  ;;  %v267_v32 = vunpack.c.h.bf16 %v230_v24  ;;  %v272_v33 = vunpack.c.l.bf16 %v236_v25  ;;  %v273_v34 = vunpack.c.h.bf16 %v236_v25  ;;  %v1831_v35 = vld [vmem:[%s2047_s11] sm:$0xff]   ;;  %v1854_v40 = vld [vmem:[%s2047_s11 + $0x18] sm:$0xff]   ;;  %v1855_v6 = vld [vmem:[%s2047_s11 + $0x30] sm:$0xff]  }
  0x17   : > { %v278_v36 = vunpack.c.l.bf16 %v242_v26  ;;  %v279_v37 = vunpack.c.h.bf16 %v242_v26  ;;  %v1832_v47 = vunpack.c.l.bf16 %v1831_v35  ;;  %v1833_v48 = vunpack.c.h.bf16 %v1831_v35 }
  0x18   : > { %v302_v41 = vmax.f32 %v266_v31, 0.0  ;;  %v2080_v42 = vmax.f32 %v267_v32, 0.0  ;;  %v2082_v43 = vmax.f32 %v272_v33, 0.0  ;;  %v2084_v44 = vmax.f32 %v273_v34, 0.0 }
  0x19   : > { %v2086_v45 = vmax.f32 %v278_v36, 0.0  ;;  %v2088_v46 = vmax.f32 %v279_v37, 0.0  ;;  %v1836_v52 = vunpack.c.l.bf16 %v1854_v40  ;;  %v1837_v0 = vunpack.c.h.bf16 %v1854_v40 }
  0x1a   : > { %v364_v49 = vmul.f32 %v2054_v22, %v302_v41  ;;  %v2093_v50 = vmul.f32 %v2054_v22, %v2080_v42  ;;  %v491_v51 = vmul.f32 %v2058_v23, %v302_v41  ;;  %v343_v53 = vmul.f32 %v2050_v21, %v302_v41 }
  0x1b   : > { %v2099_v54 = vmul.f32 %v2058_v23, %v2080_v42  ;;  %v654_v55 = vmul.f32 %v2067_v28, %v2082_v43  ;;  %v2105_v56 = vmul.f32 %v2067_v28, %v2084_v44  ;;  %v778_v60 = vmul.f32 %v2069_v29, %v2082_v43 }
  0x1c   : > { %v415_v57 = vrot.slane %v364_v49, 2  ;;  %v416_v58 = vrot.slane %v2093_v50, 2  ;;  %v542_v59 = vrot.slane %v491_v51, 4  ;;  %v2113_v63 = vmul.f32 %v2069_v29, %v2084_v44 }
  0x1d   : > { %v543_v61 = vrot.slane %v2099_v54, 4  ;;  %v704_v62 = vrot.slane %v654_v55, 2  ;;  %v705_v2 = vrot.slane %v2105_v56, 2  ;;  %v828_v3 = vrot.slane %v778_v60, 4 }
  0x1e   : > { %v417_v1 = vsel %vm409_vm0, %v415_v57, %v416_v58  ;;  %v940_v4 = vmul.f32 %v2074_v38, %v2086_v45  ;;  %v615_v9 = vmul.f32 %v2065_v27, %v2082_v43  ;;  %v829_v10 = vrot.slane %v2113_v63, 4 }
  0x1f   : > { %v468_v7 = vadd.f32 %v417_v1, %v343_v53  ;;  %v544_v8 = vsel %vm536_vm1, %v542_v59, %v543_v61  ;;  %v2130_v11 = vmul.f32 %v2074_v38, %v2088_v46  ;;  %v1066_v17 = vmul.f32 %v2077_v39, %v2086_v45 }
  0x20   : > { %v990_v16 = vrot.slane %v940_v4, 2  ;;  %v2136_v18 = vmul.f32 %v2077_v39, %v2088_v46  ;;  %v903_v20 = vmul.f32 %v2071_v30, %v2086_v45  ;;  %v1840_v24 = vunpack.c.l.bf16 %v1855_v6 }
  0x21   : > { %v595_v19 = vadd.f32 %v544_v8, %v468_v7  ;;  %v1841_v25 = vunpack.c.h.bf16 %v1855_v6  ;;  %v706_v26 = vsel %vm409_vm0, %v704_v62, %v705_v2  ;;  %v830_v31 = vsel %vm536_vm1, %v828_v3, %v829_v10 }
  0x22   : > { %v991_v32 = vrot.slane %v2130_v11, 2  ;;  %v299_v33 = vmax.f32 %v1832_v47, 0.0  ;;  %v2147_v35 = vmax.f32 %v1833_v48, 0.0  ;;  %v2149_v36 = vmax.f32 %v1836_v52, 0.0  ;;  %v2283_v11 = vld [vmem:[%s2047_s11 + $0x48] sm:$0xff]  }
  0x23   : > { %v631_v34 = vadd.f32 %v615_v9, %v595_v19  ;;  %v2151_v37 = vmax.f32 %v1837_v0, 0.0  ;;  %v1116_v41 = vrot.slane %v1066_v17, 4  ;;  %v1117_v49 = vrot.slane %v2136_v18, 4 }
  0x24   : > { %v992_v40 = vsel %vm409_vm0, %v990_v16, %v991_v32  ;;  %v2157_v51 = vmax.f32 %v1840_v24, 0.0  ;;  %v2159_v55 = vmax.f32 %v1841_v25, 0.0  ;;  %v361_v47 = vmul.f32 %v2054_v22, %v299_v33 }
  0x25   : > { %v757_v53 = vadd.f32 %v706_v26, %v631_v34  ;;  %v2164_v48 = vmul.f32 %v2054_v22, %v2147_v35  ;;  %v341_v52 = vmul.f32 %v2050_v21, %v299_v33  ;;  %v488_v57 = vmul.f32 %v2058_v23, %v299_v33 }
  0x26   : > { %v2170_v59 = vmul.f32 %v2058_v23, %v2147_v35  ;;  %v651_v60 = vmul.f32 %v2067_v28, %v2149_v36  ;;  %v410_v0 = vrot.slane %v361_v47, 2  ;;  %v2177_v3 = vmul.f32 %v2067_v28, %v2151_v37 }
  0x27   : > { %v881_v62 = vadd.f32 %v830_v31, %v757_v53  ;;  %v411_v1 = vrot.slane %v2164_v48, 2  ;;  %v537_v4 = vrot.slane %v488_v57, 4  ;;  %v775_v8 = vmul.f32 %v2069_v29, %v2149_v36  ;;  %v232_v31 = vld [vmem:[%s2047_s11 + $0x14] sm:$0x3] }
  0x28   : > { %v3126_v6 = vrot.slane %v2170_v59, 4  ;;  %v699_v7 = vrot.slane %v651_v60, 2  ;;  %v3127_v17 = vrot.slane %v2177_v3, 2  ;;  %v2188_v19 = vmul.f32 %v2069_v29, %v2151_v37 }
  0x29   : > { %v919_v9 = vadd.f32 %v903_v20, %v881_v62  ;;  %v412_v16 = vsel %vm409_vm0, %v410_v0, %v411_v1  ;;  %v1118_v24 = vsel %vm536_vm1, %v1116_v41, %v1117_v49  ;;  %v613_v26 = vmul.f32 %v2065_v27, %v2149_v36  ;;  %v244_v62 = vld [vmem:[%s2047_s11 + $0x44] sm:$0x3] }
  0x2a   : > { %v466_v25 = vadd.f32 %v412_v16, %v341_v52  ;;  %v539_v20 = vsel %vm536_vm1, %v537_v4, %v3126_v6  ;;  %v823_v34 = vrot.slane %v775_v8, 4  ;;  %v3128_v53 = vrot.slane %v2188_v19, 4  ;;  %v229_v6 = vld [vmem:[%s2047_s11 + $0x8] sm:$0x3] }
  0x2b   : > { %v1043_v33 = vadd.f32 %v992_v40, %v919_v9  ;;  %v937_v47 = vmul.f32 %v2074_v38, %v2157_v51  ;;  %v2204_v41 = vmul.f32 %v2074_v38, %v2159_v55  ;;  %v1063_v52 = vmul.f32 %v2077_v39, %v2157_v51  ;;  %v238_v40 = vld [vmem:[%s2047_s11 + $0x2c] sm:$0x3] }
  0x2c   : > { %v593_v57 = vadd.f32 %v539_v20, %v466_v25  ;;  %v2210_v60 = vmul.f32 %v2077_v39, %v2159_v55  ;;  %v701_v4 = vsel %vm409_vm0, %v699_v7, %v3127_v17  ;;  %v268_v9 = vunpack.c.l.bf16 %v232_v31  ;;  %v235_v7 = vld [vmem:[%s2047_s11 + $0x20] sm:$0x3] }
  0x2d   : > { %v2214_v0 = vadd.f32 %v1118_v24, %v1043_v33  ;;  %v985_v8 = vrot.slane %v937_v47, 2  ;;  %v3129_v25 = vrot.slane %v2204_v41, 2  ;;  %v1111_v20 = vrot.slane %v1063_v52, 4 }
  0x2e   : > { %v629_v16 = vadd.f32 %v613_v26, %v593_v57  ;;  %v3130_v15 = vrot.slane %v2210_v60, 4  ;;  %v825_v24 = vsel %vm536_vm1, %v823_v34, %v3128_v53  ;;  %v274_v33 = vunpack.c.l.bf16 %v238_v40 }
  0x2f   : > { %1204 = vperm.xlu1 %1905, %v2214_v0   ;;  %v280_v14 = vunpack.c.l.bf16 %v244_v62  ;;  %v304_v13 = vmax.f32 %v268_v9, 0.0  ;;  %v901_v26 = vmul.f32 %v2071_v30, %v2157_v51  ;;  %v987_v31 = vsel %vm409_vm0, %v985_v8, %v3129_v25  ;;  %v241_v62 = vld [vmem:[%s2047_s11 + $0x38] sm:$0x3] }
  0x30   : > { %v755_v47 = vadd.f32 %v701_v4, %v629_v16  ;;  %v344_v57 = vmul.f32 %v2050_v21, %v2080_v42  ;;  %v2234_v52 = vmax.f32 %v274_v33, 0.0  ;;  %v1113_v9 = vsel %vm536_vm1, %v1111_v20, %v3130_v15 }
  0x31   : > { %v2236_v17 = vmax.f32 %v280_v14, 0.0  ;;  %v366_v34 = vmul.f32 %v2054_v22, %v304_v13  ;;  %v493_v40 = vmul.f32 %v2058_v23, %v304_v13  ;;  %v265_v16 = vunpack.c.l.bf16 %v229_v6 }
  0x32   : > { %v879_v4 = vadd.f32 %v825_v24, %v755_v47  ;;  %v271_v53 = vunpack.c.l.bf16 %v235_v7  ;;  %v656_v42 = vmul.f32 %v2067_v28, %v2234_v52  ;;  %v780_v14 = vmul.f32 %v2069_v29, %v2234_v52 }
  0x33   : > { %v418_v8 = vrot.slane %v366_v34, 2  ;;  %v545_v25 = vrot.slane %v493_v40, 4  ;;  %v942_v13 = vmul.f32 %v2074_v38, %v2236_v17  ;;  %v1068_v24 = vmul.f32 %v2077_v39, %v2236_v17 }
  0x34   : > { %v917_v33 = vadd.f32 %v901_v26, %v879_v4  ;;  %v277_v47 = vunpack.c.l.bf16 %v241_v62  ;;  %v707_v7 = vrot.slane %v656_v42, 2  ;;  %v831_v34 = vrot.slane %v780_v14, 4 }
  0x35   : > { %v419_v6 = vsel %vm409_vm0, %v416_v58, %v418_v8  ;;  %v546_v20 = vsel %vm536_vm1, %v543_v61, %v545_v25  ;;  %v616_v26 = vmul.f32 %v2065_v27, %v2084_v44  ;;  %v993_v4 = vrot.slane %v942_v13, 2 }
  0x36   : > { %v1041_v40 = vadd.f32 %v987_v31, %v917_v33  ;;  %v469_v15 = vadd.f32 %v419_v6, %v344_v57  ;;  %v708_v62 = vsel %vm409_vm0, %v705_v2, %v707_v7  ;;  %v904_v50 = vmul.f32 %v2071_v30, %v2088_v46 }
  0x37   : > { %v1119_v58 = vrot.slane %v1068_v24, 4  ;;  %v301_v54 = vmax.f32 %v265_v16, 0.0  ;;  %v832_v25 = vsel %vm536_vm1, %v829_v10, %v831_v34  ;;  %v307_v31 = vmax.f32 %v271_v53, 0.0 }
  0x38   : > { %v2265_v8 = vadd.f32 %v1113_v9, %v1041_v40  ;;  %v596_v61 = vadd.f32 %v546_v20, %v469_v15  ;;  %v994_v56 = vsel %vm409_vm0, %v991_v32, %v993_v4  ;;  %v2273_v57 = vmax.f32 %v277_v47, 0.0  ;;  %v247_v47 = vld [vmem:[%s2047_s11 + $0x50] sm:$0x3] }
  0x39   : > { %v363_v2 = vmul.f32 %v2054_v22, %v301_v54  ;;  %v490_v42 = vmul.f32 %v2058_v23, %v301_v54  ;;  %v342_v15 = vmul.f32 %v2050_v21, %v2147_v35  ;;  %v653_v63 = vmul.f32 %v2067_v28, %v307_v31 }
  0x3a   : > { %1194 = vperm.xlu0 %1904, %v2265_v8   ;;  %v632_v9 = vadd.f32 %v616_v26, %v596_v61  ;;  %v777_v10 = vmul.f32 %v2069_v29, %v307_v31  ;;  %v1120_v32 = vsel %vm536_vm1, %v1117_v49, %v1119_v58  ;;  %v939_v14 = vmul.f32 %v2074_v38, %v2273_v57 }
  0x3b   : > { %v413_v53 = vrot.slane %v363_v2, 2  ;;  %v540_v16 = vrot.slane %v490_v42, 4  ;;  %v702_v13 = vrot.slane %v653_v63, 2  ;;  %v1065_v35 = vmul.f32 %v2077_v39, %v2273_v57 }
  0x3c   : > { %v758_v33 = vadd.f32 %v708_v62, %v632_v9  ;;  %v826_v24 = vrot.slane %v777_v10, 4  ;;  %v3133_v18 = vrot.slane %v2170_v59, 4  ;;  %v614_v20 = vmul.f32 %v2065_v27, %v2151_v37 }
  0x3d   : > { %v414_v6 = vsel %vm409_vm0, %v411_v1, %v413_v53  ;;  %v1845_v7 = vunpack.c.h.bf16 %v2283_v11  ;;  %v902_v26 = vmul.f32 %v2071_v30, %v2159_v55  ;;  %v988_v4 = vrot.slane %v939_v14, 2 }
  0x3e   : > { %v541_v49 = vsel %vm536_vm1, %v3133_v18, %v540_v16  ;;  %v882_v34 = vadd.f32 %v832_v25, %v758_v33  ;;  %v467_v40 = vadd.f32 %v414_v6, %v342_v15  ;;  %v3134_v62 = vrot.slane %v2177_v3, 2 }
  0x3f   : > { %v3135_v1 = vrot.slane %v2188_v19, 4  ;;  %v1114_v58 = vrot.slane %v1065_v35, 4  ;;  %v283_v54 = vunpack.c.l.bf16 %v247_v47  ;;  %v2310_v42 = vmax.f32 %v1845_v7, 0.0 }
  0x40   : > { %v703_v48 = vsel %vm409_vm0, %v3134_v62, %v702_v13  ;;  %v920_v61 = vadd.f32 %v904_v50, %v882_v34  ;;  %v594_v2 = vadd.f32 %v541_v49, %v467_v40  ;;  %v368_v25 = vmul.f32 %v2054_v22, %v2151_v37 }
  0x41   : > { %v827_v59 = vsel %vm536_vm1, %v3135_v1, %v826_v24  ;;  %v2314_v9 = vmax.f32 %v283_v54, 0.0  ;;  %v346_v3 = vmul.f32 %v2050_v21, %v2151_v37  ;;  %v369_v15 = vmul.f32 %v2054_v22, %v307_v31 }
  0x42   : > { %v2321_v19 = vmul.f32 %v2058_v23, %v2151_v37  ;;  %v1044_v63 = vadd.f32 %v994_v56, %v920_v61  ;;  %v630_v10 = vadd.f32 %v614_v20, %v594_v2  ;;  %v421_v50 = vrot.slane %v368_v25, 2 }
  0x43   : > { %v496_v53 = vmul.f32 %v2058_v23, %v307_v31  ;;  %v423_v16 = vrot.slane %v369_v15, 2  ;;  %v618_v33 = vmul.f32 %v2065_v27, %v2159_v55  ;;  %v2329_v13 = vmul.f32 %v2067_v28, %v2159_v55 }
  0x44   : > { %v548_v14 = vrot.slane %v2321_v19, 4  ;;  %v2331_v24 = vadd.f32 %v1120_v32, %v1044_v63  ;;  %v756_v35 = vadd.f32 %v703_v48, %v630_v10  ;;  %v659_v56 = vmul.f32 %v2067_v28, %v2273_v57 }
  0x45   : > { %v550_v37 = vrot.slane %v496_v53, 4  ;;  %v424_v47 = vsel %vm409_vm0, %v421_v50, %v423_v16  ;;  %v710_v31 = vrot.slane %v2329_v13, 2  ;;  %v782_v6 = vmul.f32 %v2069_v29, %v2159_v55 }
  0x46   : > { %v783_v18 = vmul.f32 %v2069_v29, %v2273_v57  ;;  %1209 = vperm.xlu1 %1905, %v2331_v24   ;;  %v880_v49 = vadd.f32 %v827_v59, %v756_v35  ;;  %v471_v32 = vadd.f32 %v424_v47, %v346_v3  ;;  %v712_v7 = vrot.slane %v659_v56, 2 }
  0x47   : > { %v551_v20 = vsel %vm536_vm1, %v548_v14, %v550_v37  ;;  %v3136_v34 = vrot.slane %v2204_v41, 2  ;;  %v834_v62 = vrot.slane %v782_v6, 4  ;;  %v944_v1 = vmul.f32 %v2074_v38, %v2310_v42 }
  0x48   : > { %v836_v48 = vrot.slane %v783_v18, 4  ;;  %v918_v54 = vadd.f32 %v902_v26, %v880_v49  ;;  %v3137_v61 = vrot.slane %v2210_v60, 4  ;;  %v598_v25 = vadd.f32 %v551_v20, %v471_v32 }
  0x49   : > { %v989_v40 = vsel %vm409_vm0, %v3136_v34, %v988_v4  ;;  %v945_v59 = vmul.f32 %v2074_v38, %v2314_v9  ;;  %v713_v3 = vsel %vm409_vm0, %v710_v31, %v712_v7  ;;  %v996_v15 = vrot.slane %v944_v1, 2  ;;  %v2384_v7 = vld [vmem:[%s2047_s11 + $0x54] sm:$0xff]  }
  0x4a   : > { %v1115_v2 = vsel %vm536_vm1, %v3137_v61, %v1114_v58  ;;  %v2356_v41 = vmul.f32 %v2077_v39, %v2310_v42  ;;  %v1071_v4 = vmul.f32 %v2077_v39, %v2314_v9  ;;  %v1042_v19 = vadd.f32 %v989_v40, %v918_v54 }
  0x4b   : > { %v634_v26 = vadd.f32 %v618_v33, %v598_v25  ;;  %v998_v63 = vrot.slane %v945_v59, 2  ;;  %v1844_v60 = vunpack.c.l.bf16 %v2283_v11  ;;  %v837_v58 = vsel %vm536_vm1, %v834_v62, %v836_v48  ;;  %v250_v25 = vld [vmem:[%s2047_s11 + $0x5c] sm:$0x3] }
  0x4c   : > { %v906_v10 = vmul.f32 %v2071_v30, %v2310_v42  ;;  %v1122_v53 = vrot.slane %v2356_v41, 4  ;;  %v367_v16 = vmul.f32 %v2054_v22, %v2149_v36  ;;  %v2367_v13 = vadd.f32 %v1115_v2, %v1042_v19 }
  0x4d   : > { %v760_v35 = vadd.f32 %v713_v3, %v634_v26  ;;  %v2369_v37 = vmax.f32 %v1844_v60, 0.0  ;;  %v345_v33 = vmul.f32 %v2050_v21, %v2149_v36  ;;  %v999_v11 = vsel %vm409_vm0, %v996_v15, %v998_v63 }
  0x4e   : > { %v1124_v56 = vrot.slane %v1071_v4, 4  ;;  %v420_v47 = vrot.slane %v367_v16, 2  ;;  %v494_v6 = vmul.f32 %v2058_v23, %v2149_v36  ;;  %1199 = vperm.xlu0 %1904, %v2367_v13   ;;  %v617_v49 = vmul.f32 %v2065_v27, %v2157_v51 }
  0x4f   : > { %v884_v18 = vadd.f32 %v837_v58, %v760_v35  ;;  %v657_v32 = vmul.f32 %v2067_v28, %v2157_v51  ;;  %v781_v20 = vmul.f32 %v2069_v29, %v2157_v51  ;;  %v943_v36 = vmul.f32 %v2074_v38, %v2369_v37 }
  0x50   : > { %v422_v34 = vsel %vm409_vm0, %v420_v47, %v421_v50  ;;  %v547_v40 = vrot.slane %v494_v6, 4  ;;  %v1069_v48 = vmul.f32 %v2077_v39, %v2369_v37  ;;  %v1125_v59 = vsel %vm536_vm1, %v1122_v53, %v1124_v56 }
  0x51   : > { %v922_v1 = vadd.f32 %v906_v10, %v884_v18  ;;  %v470_v54 = vadd.f32 %v422_v34, %v345_v33  ;;  %v709_v61 = vrot.slane %v657_v32, 2  ;;  %v833_v2 = vrot.slane %v781_v20, 4 }
  0x52   : > { %v549_v3 = vsel %vm536_vm1, %v547_v40, %v548_v14  ;;  %v995_v41 = vrot.slane %v943_v36, 2  ;;  %v285_v4 = vunpack.c.h.bf16 %v2384_v7  ;;  %v905_v26 = vmul.f32 %v2071_v30, %v2369_v37 }
  0x53   : > { %v1046_v50 = vadd.f32 %v999_v11, %v922_v1  ;;  %v597_v19 = vadd.f32 %v549_v3, %v470_v54  ;;  %v1121_v63 = vrot.slane %v1069_v48, 4  ;;  %v711_v60 = vsel %vm409_vm0, %v709_v61, %v710_v31 }
  0x54   : > { %v835_v58 = vsel %vm536_vm1, %v833_v2, %v834_v62  ;;  %v997_v10 = vsel %vm409_vm0, %v995_v41, %v996_v15  ;;  %v286_v16 = vunpack.c.l.bf16 %v250_v25  ;;  %v2402_v14 = vmax.f32 %v285_v4, 0.0 }
  0x55   : > { %v2400_v35 = vadd.f32 %v1125_v59, %v1046_v50  ;;  %v633_v33 = vadd.f32 %v617_v49, %v597_v19  ;;  %v2406_v11 = vmul.f32 %v2054_v22, %v2084_v44  ;;  %v348_v56 = vmul.f32 %v2050_v21, %v2084_v44 }
  0x56   : > { %v372_v31 = vmul.f32 %v2054_v22, %v2234_v52  ;;  %v498_v62 = vmul.f32 %v2058_v23, %v2084_v44  ;;  %v499_v15 = vmul.f32 %v2058_v23, %v2234_v52  ;;  %v2417_v6 = vmax.f32 %v286_v16, 0.0 }
  0x57   : > { %1219 = vperm.xlu1 %1905, %v2400_v35   ;;  %v759_v47 = vadd.f32 %v711_v60, %v633_v33  ;;  %v426_v18 = vrot.slane %v2406_v11, 2  ;;  %v661_v49 = vmul.f32 %v2067_v28, %v2088_v46  ;;  %v662_v40 = vmul.f32 %v2067_v28, %v2236_v17 }
  0x58   : > { %v428_v32 = vrot.slane %v372_v31, 2  ;;  %v553_v20 = vrot.slane %v498_v62, 4  ;;  %v555_v34 = vrot.slane %v499_v15, 4  ;;  %v785_v52 = vmul.f32 %v2069_v29, %v2088_v46 }
  0x59   : > { %v883_v44 = vadd.f32 %v835_v58, %v759_v47  ;;  %v715_v36 = vrot.slane %v661_v49, 2  ;;  %v786_v48 = vmul.f32 %v2069_v29, %v2236_v17  ;;  %v1123_v1 = vsel %vm536_vm1, %v1121_v63, %v1122_v53 }
  0x5a   : > { %v429_v54 = vsel %vm409_vm0, %v426_v18, %v428_v32  ;;  %v556_v61 = vsel %vm536_vm1, %v553_v20, %v555_v34  ;;  %v717_v2 = vrot.slane %v662_v40, 2  ;;  %v620_v3 = vmul.f32 %v2065_v27, %v2088_v46 }
  0x5b   : > { %v921_v25 = vadd.f32 %v905_v26, %v883_v44  ;;  %v473_v59 = vadd.f32 %v429_v54, %v348_v56  ;;  %v839_v41 = vrot.slane %v785_v52, 4  ;;  %v841_v4 = vrot.slane %v786_v48, 4  ;;  %v2469_v48 = vld [vmem:[%s2047_s11 + $0x60] sm:$0xff]  }
  0x5c   : > { %v2435_v50 = vmul.f32 %v2074_v38, %v2402_v14  ;;  %v948_v19 = vmul.f32 %v2074_v38, %v2417_v6  ;;  %v2441_v53 = vmul.f32 %v2077_v39, %v2402_v14  ;;  %v718_v26 = vsel %vm409_vm0, %v715_v36, %v717_v2 }
  0x5d   : > { %v1045_v63 = vadd.f32 %v997_v10, %v921_v25  ;;  %v600_v60 = vadd.f32 %v556_v61, %v473_v59  ;;  %v1074_v58 = vmul.f32 %v2077_v39, %v2417_v6  ;;  %v284_v56 = vunpack.c.l.bf16 %v2384_v7 }
  0x5e   : > { %v1001_v16 = vrot.slane %v2435_v50, 2  ;;  %v1003_v33 = vrot.slane %v948_v19, 2  ;;  %v1127_v11 = vrot.slane %v2441_v53, 4  ;;  %v908_v10 = vmul.f32 %v2071_v30, %v2402_v14 }
  0x5f   : > { %v2449_v31 = vadd.f32 %v1123_v1, %v1045_v63  ;;  %v636_v62 = vadd.f32 %v620_v3, %v600_v60  ;;  %v1129_v15 = vrot.slane %v1074_v58, 4  ;;  %v842_v47 = vsel %vm536_vm1, %v839_v41, %v841_v4  ;;  %v253_v4 = vld [vmem:[%s2047_s11 + $0x68] sm:$0x3] }
  0x60   : > { %v2454_v49 = vmax.f32 %v284_v56, 0.0  ;;  %v370_v32 = vmul.f32 %v2054_v22, %v2082_v43  ;;  %v497_v34 = vmul.f32 %v2058_v23, %v2082_v43  ;;  %v1004_v40 = vsel %vm409_vm0, %v1001_v16, %v1003_v33 }
  0x61   : > { %1214 = vperm.xlu0 %1904, %v2449_v31   ;;  %v762_v7 = vadd.f32 %v718_v26, %v636_v62  ;;  %v347_v44 = vmul.f32 %v2050_v21, %v2082_v43  ;;  %v660_v52 = vmul.f32 %v2067_v28, %v2086_v45  ;;  %v1130_v1 = vsel %vm536_vm1, %v1127_v11, %v1129_v15 }
  0x62   : > { %v425_v54 = vrot.slane %v370_v32, 2  ;;  %v552_v61 = vrot.slane %v497_v34, 4  ;;  %v784_v2 = vmul.f32 %v2069_v29, %v2086_v45  ;;  %v946_v3 = vmul.f32 %v2074_v38, %v2454_v49 }
  0x63   : > { %v886_v25 = vadd.f32 %v842_v47, %v762_v7  ;;  %v714_v59 = vrot.slane %v660_v52, 2  ;;  %v1072_v43 = vmul.f32 %v2077_v39, %v2454_v49  ;;  %v1849_v26 = vunpack.c.h.bf16 %v2469_v48 }
  0x64   : > { %v427_v19 = vsel %vm409_vm0, %v425_v54, %v426_v18  ;;  %v554_v63 = vsel %vm536_vm1, %v552_v61, %v553_v20  ;;  %v838_v60 = vrot.slane %v784_v2, 4  ;;  %v619_v56 = vmul.f32 %v2065_v27, %v2086_v45 }
  0x65   : > { %v924_v58 = vadd.f32 %v908_v10, %v886_v25  ;;  %v472_v33 = vadd.f32 %v427_v19, %v347_v44  ;;  %v907_v62 = vmul.f32 %v2071_v30, %v2454_v49  ;;  %v716_v15 = vsel %vm409_vm0, %v714_v59, %v715_v36 }
  0x66   : > { %v840_v47 = vsel %vm536_vm1, %v838_v60, %v839_v41  ;;  %v1000_v32 = vrot.slane %v946_v3, 2  ;;  %v289_v34 = vunpack.c.l.bf16 %v253_v4  ;;  %v1126_v20 = vrot.slane %v1072_v43, 4 }
  0x67   : > { %v1048_v18 = vadd.f32 %v1004_v40, %v924_v58  ;;  %v599_v7 = vadd.f32 %v554_v63, %v472_v33  ;;  %v2490_v52 = vmax.f32 %v1849_v26, 0.0  ;;  %v350_v10 = vmul.f32 %v2050_v21, %v2159_v55 }
  0x68   : > { %v2492_v54 = vmax.f32 %v289_v34, 0.0  ;;  %v374_v44 = vmul.f32 %v2054_v22, %v2159_v55  ;;  %v375_v36 = vmul.f32 %v2054_v22, %v2273_v57  ;;  %v2504_v40 = vmul.f32 %v2058_v23, %v2159_v55 }
  0x69   : > { %v2500_v61 = vadd.f32 %v1130_v1, %v1048_v18  ;;  %v635_v41 = vadd.f32 %v619_v56, %v599_v7  ;;  %v502_v2 = vmul.f32 %v2058_v23, %v2273_v57  ;;  %v622_v3 = vmul.f32 %v2065_v27, %v2310_v42 }
  0x6a   : > { %v431_v25 = vrot.slane %v374_v44, 2  ;;  %v433_v59 = vrot.slane %v375_v36, 2  ;;  %v2512_v43 = vmul.f32 %v2067_v28, %v2310_v42  ;;  %v558_v4 = vrot.slane %v2504_v40, 4 }
  0x6b   : > { %1229 = vperm.xlu1 %1905, %v2500_v61   ;;  %v761_v1 = vadd.f32 %v716_v15, %v635_v41  ;;  %v560_v19 = vrot.slane %v502_v2, 4  ;;  %v665_v55 = vmul.f32 %v2067_v28, %v2314_v9  ;;  %v788_v60 = vmul.f32 %v2069_v29, %v2310_v42 }
  0x6c   : > { %v434_v57 = vsel %vm409_vm0, %v431_v25, %v433_v59  ;;  %v720_v63 = vrot.slane %v2512_v43, 2  ;;  %v789_v26 = vmul.f32 %v2069_v29, %v2314_v9  ;;  %v1002_v34 = vsel %vm409_vm0, %v1000_v32, %v1001_v16 }
  0x6d   : > { %v885_v58 = vadd.f32 %v840_v47, %v761_v1  ;;  %v475_v33 = vadd.f32 %v434_v57, %v350_v10  ;;  %v561_v56 = vsel %vm536_vm1, %v558_v4, %v560_v19  ;;  %v722_v15 = vrot.slane %v665_v55, 2 }
  0x6e   : > { %v844_v18 = vrot.slane %v788_v60, 4  ;;  %v846_v7 = vrot.slane %v789_v26, 4  ;;  %v950_v44 = vmul.f32 %v2074_v38, %v2490_v52  ;;  %v1128_v41 = vsel %vm536_vm1, %v1126_v20, %v1127_v11 }
  0x6f   : > { %v923_v36 = vadd.f32 %v907_v62, %v885_v58  ;;  %v602_v40 = vadd.f32 %v561_v56, %v475_v33  ;;  %v951_v47 = vmul.f32 %v2074_v38, %v2492_v54  ;;  %v723_v10 = vsel %vm409_vm0, %v720_v63, %v722_v15 }
  0x70   : > { %v1006_v2 = vrot.slane %v950_v44, 2  ;;  %v2538_v50 = vmul.f32 %v2077_v39, %v2490_v52  ;;  %v1077_v16 = vmul.f32 %v2077_v39, %v2492_v54  ;;  %v1848_v53 = vunpack.c.l.bf16 %v2469_v48 }
  0x71   : > { %v1047_v32 = vadd.f32 %v1002_v34, %v923_v36  ;;  %v638_v62 = vadd.f32 %v622_v3, %v602_v40  ;;  %v1008_v59 = vrot.slane %v951_v47, 2  ;;  %v847_v11 = vsel %vm536_vm1, %v844_v18, %v846_v7  ;;  %v2566_v7 = vld [vmem:[%s2047_s11 + $0x6c] sm:$0xff]  }
  0x72   : > { %v910_v20 = vmul.f32 %v2071_v30, %v2490_v52  ;;  %v1132_v43 = vrot.slane %v2538_v50, 4  ;;  %v373_v1 = vmul.f32 %v2054_v22, %v2157_v51  ;;  %v2551_v57 = vmax.f32 %v1848_v53, 0.0 }
  0x73   : > { %v2549_v19 = vadd.f32 %v1128_v41, %v1047_v32  ;;  %v764_v55 = vadd.f32 %v723_v10, %v638_v62  ;;  %v349_v3 = vmul.f32 %v2050_v21, %v2157_v51  ;;  %v1009_v48 = vsel %vm409_vm0, %v1006_v2, %v1008_v59 }
  0x74   : > { %v1134_v60 = vrot.slane %v1077_v16, 4  ;;  %v430_v26 = vrot.slane %v373_v1, 2  ;;  %v500_v58 = vmul.f32 %v2058_v23, %v2157_v51  ;;  %v621_v56 = vmul.f32 %v2065_v27, %v2369_v37  ;;  %v256_v16 = vld [vmem:[%s2047_s11 + $0x74] sm:$0x3] }
  0x75   : > { %1224 = vperm.xlu0 %1904, %v2549_v19   ;;  %v888_v33 = vadd.f32 %v847_v11, %v764_v55  ;;  %v663_v15 = vmul.f32 %v2067_v28, %v2369_v37  ;;  %v787_v34 = vmul.f32 %v2069_v29, %v2369_v37  ;;  %v949_v51 = vmul.f32 %v2074_v38, %v2551_v57 }
  0x76   : > { %v432_v44 = vsel %vm409_vm0, %v430_v26, %v431_v25  ;;  %v557_v36 = vrot.slane %v500_v58, 4  ;;  %v1075_v41 = vmul.f32 %v2077_v39, %v2551_v57  ;;  %v1135_v32 = vsel %vm536_vm1, %v1132_v43, %v1134_v60 }
  0x77   : > { %v926_v40 = vadd.f32 %v910_v20, %v888_v33  ;;  %v474_v47 = vadd.f32 %v432_v44, %v349_v3  ;;  %v719_v10 = vrot.slane %v663_v15, 2  ;;  %v843_v50 = vrot.slane %v787_v34, 4 }
  0x78   : > { %v559_v62 = vsel %vm536_vm1, %v557_v36, %v558_v4  ;;  %v1005_v59 = vrot.slane %v949_v51, 2  ;;  %v291_v53 = vunpack.c.h.bf16 %v2566_v7  ;;  %v909_v1 = vmul.f32 %v2071_v30, %v2551_v57 }
  0x79   : > { %v1050_v25 = vadd.f32 %v1009_v48, %v926_v40  ;;  %v601_v11 = vadd.f32 %v559_v62, %v474_v47  ;;  %v1131_v55 = vrot.slane %v1075_v41, 4  ;;  %v721_v26 = vsel %vm409_vm0, %v719_v10, %v720_v63 }
  0x7a   : > { %v845_v20 = vsel %vm536_vm1, %v843_v50, %v844_v18  ;;  %v1007_v3 = vsel %vm409_vm0, %v1005_v59, %v1006_v2  ;;  %v292_v58 = vunpack.c.l.bf16 %v256_v16  ;;  %v2584_v4 = vmax.f32 %v291_v53, 0.0 }
  0x7b   : > { %v2582_v33 = vadd.f32 %v1135_v32, %v1050_v25  ;;  %v637_v60 = vadd.f32 %v621_v56, %v601_v11  ;;  %v2588_v48 = vmul.f32 %v2054_v22, %v2088_v46  ;;  %v352_v15 = vmul.f32 %v2050_v21, %v2088_v46 }
  0x7c   : > { %v378_v63 = vmul.f32 %v2054_v22, %v2236_v17  ;;  %v504_v18 = vmul.f32 %v2058_v23, %v2088_v46  ;;  %v505_v2 = vmul.f32 %v2058_v23, %v2236_v17  ;;  %v2599_v34 = vmax.f32 %v292_v58, 0.0 }
  0x7d   : > { %1239 = vperm.xlu1 %1905, %v2582_v33   ;;  %v763_v56 = vadd.f32 %v721_v26, %v637_v60  ;;  %v436_v44 = vrot.slane %v2588_v48, 2  ;;  %v667_v36 = vmul.f32 %v2067_v28, %v2402_v14  ;;  %v668_v47 = vmul.f32 %v2067_v28, %v2417_v6 }
  0x7e   : > { %v438_v51 = vrot.slane %v378_v63, 2  ;;  %v563_v41 = vrot.slane %v504_v18, 4  ;;  %v565_v40 = vrot.slane %v505_v2, 4  ;;  %v791_v17 = vmul.f32 %v2069_v29, %v2402_v14 }
  0x7f   : > { %v887_v46 = vadd.f32 %v845_v20, %v763_v56  ;;  %v725_v10 = vrot.slane %v667_v36, 2  ;;  %v792_v50 = vmul.f32 %v2069_v29, %v2417_v6  ;;  %v1133_v16 = vsel %vm536_vm1, %v1131_v55, %v1132_v43 }
  0x80   : > { %v439_v32 = vsel %vm409_vm0, %v436_v44, %v438_v51  ;;  %v566_v62 = vsel %vm536_vm1, %v563_v41, %v565_v40  ;;  %v727_v59 = vrot.slane %v668_v47, 2  ;;  %v624_v11 = vmul.f32 %v2065_v27, %v2402_v14 }
  0x81   : > { %v925_v53 = vadd.f32 %v909_v1, %v887_v46  ;;  %v477_v25 = vadd.f32 %v439_v32, %v352_v15  ;;  %v849_v26 = vrot.slane %v791_v17, 4  ;;  %v851_v20 = vrot.slane %v792_v50, 4 }
  0x82   : > { %v2617_v58 = vmul.f32 %v2074_v38, %v2584_v4  ;;  %v954_v60 = vmul.f32 %v2074_v38, %v2599_v34  ;;  %v2623_v43 = vmul.f32 %v2077_v39, %v2584_v4  ;;  %v728_v1 = vsel %vm409_vm0, %v725_v10, %v727_v59  ;;  %v2651_v59 = vld [vmem:[%s2047_s11 + $0x78] sm:$0xff]  }
  0x83   : > { %v1049_v55 = vadd.f32 %v1007_v3, %v925_v53  ;;  %v604_v48 = vadd.f32 %v566_v62, %v477_v25  ;;  %v1080_v15 = vmul.f32 %v2077_v39, %v2599_v34  ;;  %v290_v56 = vunpack.c.l.bf16 %v2566_v7 }
  0x84   : > { %v3132_v63 = vrot.slane %v2617_v58, 2  ;;  %v1013_v18 = vrot.slane %v954_v60, 2  ;;  %v3131_v2 = vrot.slane %v2623_v43, 4  ;;  %v912_v3 = vmul.f32 %v2071_v30, %v2584_v4 }
  0x85   : > { %v2631_v36 = vadd.f32 %v1133_v16, %v1049_v55  ;;  %v640_v51 = vadd.f32 %v624_v11, %v604_v48  ;;  %v1139_v40 = vrot.slane %v1080_v15, 4  ;;  %v852_v47 = vsel %vm536_vm1, %v849_v26, %v851_v20 }
  0x86   : > { %v2636_v46 = vmax.f32 %v290_v56, 0.0  ;;  %v376_v17 = vmul.f32 %v2054_v22, %v2086_v45  ;;  %v503_v50 = vmul.f32 %v2058_v23, %v2086_v45  ;;  %v1014_v16 = vsel %vm409_vm0, %v3132_v63, %v1013_v18 }
  0x87   : > { %1234 = vperm.xlu0 %1904, %v2631_v36   ;;  %v766_v7 = vadd.f32 %v728_v1, %v640_v51  ;;  %v351_v32 = vmul.f32 %v2050_v21, %v2086_v45  ;;  %v666_v62 = vmul.f32 %v2067_v28, %v2454_v49  ;;  %v1140_v53 = vsel %vm536_vm1, %v3131_v2, %v1139_v40  ;;  %v259_v1 = vld [vmem:[%s2047_s11 + $0x80] sm:$0x3] }
  0x88   : > { %v435_v25 = vrot.slane %v376_v17, 2  ;;  %v562_v11 = vrot.slane %v503_v50, 4  ;;  %v790_v20 = vmul.f32 %v2069_v29, %v2454_v49  ;;  %v952_v48 = vmul.f32 %v2074_v38, %v2636_v46 }
  0x89   : > { %v890_v60 = vadd.f32 %v852_v47, %v766_v7  ;;  %v724_v55 = vrot.slane %v666_v62, 2  ;;  %v1078_v45 = vmul.f32 %v2077_v39, %v2636_v46  ;;  %v1853_v51 = vunpack.c.h.bf16 %v2651_v59 }
  0x8a   : > { %v437_v15 = vsel %vm409_vm0, %v435_v25, %v436_v44  ;;  %v564_v18 = vsel %vm536_vm1, %v562_v11, %v563_v41  ;;  %v848_v56 = vrot.slane %v790_v20, 4  ;;  %v623_v47 = vmul.f32 %v2065_v27, %v2454_v49 }
  0x8b   : > { %v928_v40 = vadd.f32 %v912_v3, %v890_v60  ;;  %v476_v17 = vadd.f32 %v437_v15, %v351_v32  ;;  %v911_v50 = vmul.f32 %v2071_v30, %v2636_v46  ;;  %v726_v7 = vsel %vm409_vm0, %v724_v55, %v725_v10 }
  0x8c   : > { %v850_v62 = vsel %vm536_vm1, %v848_v56, %v849_v26  ;;  %v1010_v2 = vrot.slane %v952_v48, 2  ;;  %v295_v63 = vunpack.c.l.bf16 %v259_v1  ;;  %v1136_v41 = vrot.slane %v1078_v45, 4 }
  0x8d   : > { %v1052_v44 = vadd.f32 %v1014_v16, %v928_v40  ;;  %v603_v25 = vadd.f32 %v564_v18, %v476_v17  ;;  %v330_v11 = vmax.f32 %v1853_v51, 0.0  ;;  %v354_v3 = vmul.f32 %v2050_v21, %v2310_v42 }
  0x8e   : > { %v331_v20 = vmax.f32 %v295_v63, 0.0  ;;  %v380_v32 = vmul.f32 %v2054_v22, %v2310_v42  ;;  %v381_v60 = vmul.f32 %v2054_v22, %v2314_v9  ;;  %v2682_v26 = vmul.f32 %v2058_v23, %v2310_v42 }
  0x8f   : > { %v2678_v15 = vadd.f32 %v1140_v53, %v1052_v44  ;;  %v639_v10 = vadd.f32 %v623_v47, %v603_v25  ;;  %v508_v16 = vmul.f32 %v2058_v23, %v2314_v9  ;;  %v626_v48 = vmul.f32 %v2065_v27, %v2490_v52 }
  0x90   : > { %v441_v63 = vrot.slane %v380_v32, 2  ;;  %v443_v55 = vrot.slane %v381_v60, 2  ;;  %v2690_v45 = vmul.f32 %v2067_v28, %v2490_v52  ;;  %v568_v1 = vrot.slane %v2682_v26, 4 }
  0x91   : > { %1249 = vperm.xlu1 %1905, %v2678_v15   ;;  %v765_v53 = vadd.f32 %v726_v7, %v639_v10  ;;  %v570_v18 = vrot.slane %v508_v16, 4  ;;  %v671_v42 = vmul.f32 %v2067_v28, %v2492_v54  ;;  %v794_v51 = vmul.f32 %v2069_v29, %v2490_v52 }
  0x92   : > { %v444_v9 = vsel %vm409_vm0, %v441_v63, %v443_v55  ;;  %v730_v56 = vrot.slane %v2690_v45, 2  ;;  %v795_v40 = vmul.f32 %v2069_v29, %v2492_v54  ;;  %v3138_v25 = vrot.slane %v2617_v58, 2 }
  0x93   : > { %v889_v17 = vadd.f32 %v850_v62, %v765_v53  ;;  %v479_v47 = vadd.f32 %v444_v9, %v354_v3  ;;  %v571_v7 = vsel %vm536_vm1, %v568_v1, %v570_v18  ;;  %v732_v44 = vrot.slane %v671_v42, 2 }
  0x94   : > { %v1012_v32 = vsel %vm409_vm0, %v1010_v2, %v3138_v25  ;;  %v854_v60 = vrot.slane %v794_v51, 4  ;;  %v856_v10 = vrot.slane %v795_v40, 4  ;;  %v956_v26 = vmul.f32 %v2074_v38, %v330_v11 }
  0x95   : > { %v927_v16 = vadd.f32 %v911_v50, %v889_v17  ;;  %v3139_v55 = vrot.slane %v2623_v43, 4  ;;  %v606_v45 = vadd.f32 %v571_v7, %v479_v47  ;;  %v957_v54 = vmul.f32 %v2074_v38, %v331_v20 }
  0x96   : > { %v733_v62 = vsel %vm409_vm0, %v730_v56, %v732_v44  ;;  %v1016_v3 = vrot.slane %v956_v26, 2  ;;  %v2713_v53 = vmul.f32 %v2077_v39, %v330_v11  ;;  %v1083_v58 = vmul.f32 %v2077_v39, %v331_v20  ;;  %v2737_v26 = vld [vmem:[%s2047_s11 + $0x84] sm:$0xff]  }
  0x97   : > { %v1138_v52 = vsel %vm536_vm1, %v1136_v41, %v3139_v55  ;;  %v1051_v2 = vadd.f32 %v1012_v32, %v927_v16  ;;  %v642_v18 = vadd.f32 %v626_v48, %v606_v45  ;;  %v1018_v42 = vrot.slane %v957_v54, 2 }
  0x98   : > { %v1852_v50 = vunpack.c.l.bf16 %v2651_v59  ;;  %v857_v43 = vsel %vm536_vm1, %v854_v60, %v856_v10  ;;  %v914_v41 = vmul.f32 %v2071_v30, %v330_v11  ;;  %v1142_v9 = vrot.slane %v2713_v53, 4 }
  0x99   : > { %v379_v51 = vmul.f32 %v2054_v22, %v2369_v37  ;;  %v2722_v40 = vadd.f32 %v1138_v52, %v1051_v2  ;;  %v768_v17 = vadd.f32 %v733_v62, %v642_v18  ;;  %v353_v20 = vmul.f32 %v2050_v21, %v2369_v37  ;;  %v262_v2 = vld [vmem:[%s2047_s11 + $0x8c] sm:$0x3] }
  0x9a   : > { %v329_v47 = vmax.f32 %v1852_v50, 0.0  ;;  %v1019_v48 = vsel %vm409_vm0, %v1016_v3, %v1018_v42  ;;  %v1144_v59 = vrot.slane %v1083_v58, 4  ;;  %v506_v11 = vmul.f32 %v2058_v23, %v2369_v37 }
  0x9b   : > { %v440_v7 = vrot.slane %v379_v51, 2  ;;  %1244 = vperm.xlu0 %1904, %v2722_v40   ;;  %v892_v44 = vadd.f32 %v857_v43, %v768_v17  ;;  %v625_v25 = vmul.f32 %v2065_v27, %v2551_v57  ;;  %v669_v32 = vmul.f32 %v2067_v28, %v2551_v57 }
  0x9c   : > { %v793_v10 = vmul.f32 %v2069_v29, %v2551_v57  ;;  %v567_v55 = vrot.slane %v506_v11, 4  ;;  %v955_v52 = vmul.f32 %v2074_v38, %v329_v47  ;;  %v1081_v37 = vmul.f32 %v2077_v39, %v329_v47 }
  0x9d   : > { %v442_v16 = vsel %vm409_vm0, %v440_v7, %v441_v63  ;;  %v930_v45 = vadd.f32 %v914_v41, %v892_v44  ;;  %v729_v62 = vrot.slane %v669_v32, 2  ;;  %v1145_v18 = vsel %vm536_vm1, %v1142_v9, %v1144_v59 }
  0x9e   : > { %v478_v54 = vadd.f32 %v442_v16, %v353_v20  ;;  %v853_v58 = vrot.slane %v793_v10, 4  ;;  %v569_v57 = vsel %vm536_vm1, %v567_v55, %v568_v1  ;;  %v1015_v42 = vrot.slane %v955_v52, 2 }
  0x9f   : > { %v297_v50 = vunpack.c.h.bf16 %v2737_v26  ;;  %v1054_v63 = vadd.f32 %v1019_v48, %v930_v45  ;;  %v913_v51 = vmul.f32 %v2071_v30, %v329_v47  ;;  %v1141_v17 = vrot.slane %v1081_v37, 4 }
  0xa0   : > { %v605_v43 = vadd.f32 %v569_v57, %v478_v54  ;;  %v731_v41 = vsel %vm409_vm0, %v729_v62, %v730_v56  ;;  %v855_v20 = vsel %vm536_vm1, %v853_v58, %v854_v60  ;;  %v1017_v7 = vsel %vm409_vm0, %v1015_v42, %v1016_v3 }
  0xa1   : > { %v298_v11 = vunpack.c.l.bf16 %v262_v2  ;;  %v2752_v44 = vadd.f32 %v1145_v18, %v1054_v63  ;;  %v333_v32 = vmax.f32 %v297_v50, 0.0  ;;  %v383_v1 = vmul.f32 %v2054_v22, %v2402_v14 }
  0xa2   : > { %v641_v59 = vadd.f32 %v625_v25, %v605_v43  ;;  %v356_v48 = vmul.f32 %v2050_v21, %v2402_v14  ;;  %v384_v47 = vmul.f32 %v2054_v22, %v2417_v6  ;;  %v510_v56 = vmul.f32 %v2058_v23, %v2402_v14 }
  0xa3   : > { %v511_v60 = vmul.f32 %v2058_v23, %v2417_v6  ;;  %1259 = vperm.xlu1 %1905, %v2752_v44   ;;  %v334_v25 = vmax.f32 %v298_v11, 0.0  ;;  %v446_v10 = vrot.slane %v383_v1, 2  ;;  %v673_v16 = vmul.f32 %v2067_v28, %v2584_v4 }
  0xa4   : > { %v767_v3 = vadd.f32 %v731_v41, %v641_v59  ;;  %v448_v55 = vrot.slane %v384_v47, 2  ;;  %v573_v52 = vrot.slane %v510_v56, 4  ;;  %v674_v45 = vmul.f32 %v2067_v28, %v2599_v34 }
  0xa5   : > { %v575_v37 = vrot.slane %v511_v60, 4  ;;  %v628_v14 = vmul.f32 %v2065_v27, %v2584_v4  ;;  %v797_v6 = vmul.f32 %v2069_v29, %v2584_v4  ;;  %v798_v62 = vmul.f32 %v2069_v29, %v2599_v34 }
  0xa6   : > { %v891_v54 = vadd.f32 %v855_v20, %v767_v3  ;;  %v449_v58 = vsel %vm409_vm0, %v446_v10, %v448_v55  ;;  %v735_v18 = vrot.slane %v673_v16, 2  ;;  %v737_v57 = vrot.slane %v674_v45, 2 }
  0xa7   : > { %v576_v2 = vsel %vm536_vm1, %v573_v52, %v575_v37  ;;  %v481_v50 = vadd.f32 %v449_v58, %v356_v48  ;;  %v859_v63 = vrot.slane %v797_v6, 4  ;;  %v861_v43 = vrot.slane %v798_v62, 4 }
  0xa8   : > { %v929_v42 = vadd.f32 %v913_v51, %v891_v54  ;;  %v1143_v41 = vsel %vm536_vm1, %v1141_v17, %v1142_v9  ;;  %v959_v20 = vmul.f32 %v2074_v38, %v333_v32  ;;  %v960_v4 = vmul.f32 %v2074_v38, %v334_v25 }
  0xa9   : > { %v1085_v34 = vmul.f32 %v2077_v39, %v333_v32  ;;  %v608_v59 = vadd.f32 %v576_v2, %v481_v50  ;;  %v1086_v1 = vmul.f32 %v2077_v39, %v334_v25  ;;  %v738_v47 = vsel %vm409_vm0, %v735_v18, %v737_v57 }
  0xaa   : > { %v1053_v11 = vadd.f32 %v1017_v7, %v929_v42  ;;  %v916_v51 = vmul.f32 %v2071_v30, %v333_v32  ;;  %v296_v48 = vunpack.c.l.bf16 %v2737_v26  ;;  %v862_v9 = vsel %vm536_vm1, %v859_v63, %v861_v43 }
  0xab   : > { %v644_v53 = vadd.f32 %v628_v14, %v608_v59  ;;  %v1021_v17 = vrot.slane %v959_v20, 2  ;;  %v1023_v60 = vrot.slane %v960_v4, 2  ;;  %v1147_v3 = vrot.slane %v1085_v34, 4 }
  0xac   : > { %v2787_v56 = vadd.f32 %v1143_v41, %v1053_v11  ;;  %v382_v7 = vmul.f32 %v2054_v22, %v2454_v49  ;;  %v509_v25 = vmul.f32 %v2058_v23, %v2454_v49  ;;  %v1149_v32 = vrot.slane %v1086_v1, 4 }
  0xad   : > { %v770_v16 = vadd.f32 %v738_v47, %v644_v53  ;;  %v355_v26 = vmul.f32 %v2050_v21, %v2454_v49  ;;  %v672_v55 = vmul.f32 %v2067_v28, %v2636_v46  ;;  %v332_v37 = vmax.f32 %v296_v48, 0.0 }
  0xae   : > { %1254 = vperm.xlu0 %1904, %v2787_v56   ;;  %v445_v45 = vrot.slane %v382_v7, 2  ;;  %v572_v54 = vrot.slane %v509_v25, 4  ;;  %v796_v14 = vmul.f32 %v2069_v29, %v2636_v46  ;;  %v1024_v6 = vsel %vm409_vm0, %v1021_v17, %v1023_v60  ;;  %v2896_v7 = vld [vmem:[%s3121_s3] ss:$0 sm:$0xff] }
  0xaf   : > { %v894_v22 = vadd.f32 %v862_v9, %v770_v16  ;;  %v734_v58 = vrot.slane %v672_v55, 2  ;;  %v627_v21 = vmul.f32 %v2065_v27, %v2636_v46  ;;  %v1150_v28 = vsel %vm536_vm1, %v1147_v3, %v1149_v32 }
  0xb0   : > { %v447_v23 = vsel %vm409_vm0, %v445_v45, %v446_v10  ;;  %v574_v62 = vsel %vm536_vm1, %v572_v54, %v573_v52  ;;  %v858_v49 = vrot.slane %v796_v14, 4  ;;  %v958_v42 = vmul.f32 %v2074_v38, %v332_v37 }
  0xb1   : > { %v932_v2 = vadd.f32 %v916_v51, %v894_v22  ;;  %v480_v57 = vadd.f32 %v447_v23, %v355_v26  ;;  %v736_v43 = vsel %vm409_vm0, %v734_v58, %v735_v18  ;;  %v1084_v41 = vmul.f32 %v2077_v39, %v332_v37  ;;  %v1205_v51 = vpop.permute.xlu1 %1204 }
  0xb2   : > { %v860_v20 = vsel %vm536_vm1, %v858_v49, %v859_v63  ;;  %v1020_v4 = vrot.slane %v958_v42, 2  ;;  %v915_v46 = vmul.f32 %v2071_v30, %v332_v37  ;;  %v1953_v1 = vmov 1  }
  0xb3   : > { %v1056_v50 = vadd.f32 %v1024_v6, %v932_v2  ;;  %v607_v29 = vadd.f32 %v574_v62, %v480_v57  ;;  %v1146_v34 = vrot.slane %v1084_v41, 4  ;;  %v1954_v30 = vmov 2  }
  0xb4   : > { %v1022_v38 = vsel %vm409_vm0, %v1020_v4, %v1021_v17  ;;  %v1955_v63 = vmov 3   ;;  %v3140_v17 = vsub.s32 1, %v2024_v5 }
  0xb5   : > { %v2810_v10 = vadd.f32 %v1150_v28, %v1056_v50  ;;  %v643_v52 = vadd.f32 %v627_v21, %v607_v29  ;;  %v1148_v39 = vsel %vm536_vm1, %v1146_v34, %v1147_v3 }
  0xb7   : > { %1269 = vperm.xlu1 %1905, %v2810_v10   ;;  %v769_v27 = vadd.f32 %v736_v43, %v643_v52 }
  0xb9   : > { %v893_v11 = vadd.f32 %v860_v20, %v769_v27 }
  0xbb   : > { %v931_v59 = vadd.f32 %v915_v46, %v893_v11  ;;  %1907 = vset.pattern.permute.xlu1 %v1953_v1 }
  0xbc   : > { %1313 = vperm.xlu1 %1907, %v2367_v13  }
  0xbd   : > { %v1055_v18 = vadd.f32 %v1022_v38, %v931_v59 }
  0xbf   : > { %v1181_v47 = vadd.f32 %v1148_v39, %v1055_v18 }
  0xc0   : > { %1317 = vperm.xlu1 %1907, %v2214_v0  }
  0xc1   : > { %1264 = vperm.xlu0 %1904, %v1181_v47  }
  0xc4   : > { %1325 = vperm.xlu1 %1907, %v2449_v31  }
  0xc5   : > { %1906 = vset.pattern.permute.xlu0 %v1953_v1  ;;  %v2856_v48 = vpop.permute.xlu1 %1209 }
  0xc6   : > { %1309 = vperm.xlu0 %1906, %v2265_v8  }
  0xc8   : > { %1333 = vperm.xlu1 %1907, %v2549_v19  }
  0xca   : > { %1321 = vperm.xlu0 %1906, %v2331_v24  }
  0xcc   : > { %1341 = vperm.xlu1 %1907, %v2631_v36  }
  0xce   : > { %1329 = vperm.xlu0 %1906, %v2400_v35  }
  0xd0   : > { %1349 = vperm.xlu1 %1907, %v2722_v40  }
  0xd2   : > { %1337 = vperm.xlu0 %1906, %v2500_v61  }
  0xd4   : > { %1357 = vperm.xlu1 %1907, %v2787_v56  }
  0xd6   : > { %1345 = vperm.xlu0 %1906, %v2582_v33  }
  0xd8   : > { %1365 = vperm.xlu1 %1907, %v1181_v47  }
  0xda   : > { %1353 = vperm.xlu0 %1906, %v2678_v15  }
  0xdc   : > { %1908 = vset.pattern.permute.xlu1 %v1954_v30 }
  0xdd   : > { %1409 = vperm.xlu1 %1908, %v2265_v8  }
  0xde   : > { %1361 = vperm.xlu0 %1906, %v2752_v44  }
  0xe1   : > { %1417 = vperm.xlu1 %1908, %v2214_v0  }
  0xe2   : > { %1369 = vperm.xlu0 %1906, %v2810_v10  }
  0xe5   : > { %1421 = vperm.xlu1 %1908, %v2331_v24  }
  0xe6   : > { %1909 = vset.pattern.permute.xlu0 %v1954_v30 }
  0xe7   : > { %1413 = vperm.xlu0 %1909, %v2367_v13  }
  0xe9   : > { %1429 = vperm.xlu1 %1908, %v2400_v35  }
  0xeb   : > { %1425 = vperm.xlu0 %1909, %v2449_v31  }
  0xed   : > { %1437 = vperm.xlu1 %1908, %v2500_v61  }
  0xef   : > { %1433 = vperm.xlu0 %1909, %v2549_v19  }
  0xf1   : > { %1445 = vperm.xlu1 %1908, %v2582_v33  }
  0xf3   : > { %1441 = vperm.xlu0 %1909, %v2631_v36  }
  0xf5   : > { %1453 = vperm.xlu1 %1908, %v2678_v15  }
  0xf7   : > { %1449 = vperm.xlu0 %1909, %v2722_v40  }
  0xf9   : > { %1461 = vperm.xlu1 %1908, %v2752_v44  }
  0xfb   : > { %1457 = vperm.xlu0 %1909, %v2787_v56  }
  0xfd   : > { %1469 = vperm.xlu1 %1908, %v2810_v10  }
  0xff   : > { %1465 = vperm.xlu0 %1909, %v1181_v47  }
 0x101   : > { %1911 = vset.pattern.permute.xlu1 %v1955_v63 }
 0x102   : > { %1513 = vperm.xlu1 %1911, %v2367_v13  }
 0x103   : > { %1910 = vset.pattern.permute.xlu0 %v1955_v63 }
 0x104   : > { %1509 = vperm.xlu0 %1910, %v2265_v8   ;;  %v2863_v8 = vpop.permute.xlu1 %1219 }
 0x106   : > { %1517 = vperm.xlu1 %1911, %v2214_v0   ;;  %v2860_v0 = vpop.permute.xlu0 %1194 }
 0x108   : > { %1521 = vperm.xlu0 %1910, %v2331_v24   ;;  %v2867_v13 = vpop.permute.xlu1 %1229 }
 0x10a   : > { %1525 = vperm.xlu1 %1911, %v2449_v31   ;;  %v1200_v24 = vpop.permute.xlu0 %1199 }
 0x10c   : > { %1529 = vperm.xlu0 %1910, %v2400_v35   ;;  %v2870_v31 = vpop.permute.xlu1 %1239 }
 0x10e   : > { %1533 = vperm.xlu1 %1911, %v2549_v19   ;;  %v1215_v35 = vpop.permute.xlu0 %1214 }
 0x110   : > { %1537 = vperm.xlu0 %1910, %v2500_v61   ;;  %v2872_v19 = vpop.permute.xlu1 %1249 }
 0x112   : > { %1541 = vperm.xlu1 %1911, %v2631_v36   ;;  %v1225_v61 = vpop.permute.xlu0 %1224  ;;  %v1183_v36 = vld [vmem:[%s3120_s2] sm:$0x3] }
 0x114   : > { %1545 = vperm.xlu0 %1910, %v2582_v33  }
 0x116   : > { %1549 = vperm.xlu1 %1911, %v2722_v40   ;;  %v1235_v33 = vpop.permute.xlu0 %1234  ;;  %v2879_v40 = vunpack.c.l.bf16 %v1183_v36 }
 0x118   : > { %1553 = vperm.xlu0 %1910, %v2678_v15   ;;  %v2891_v60 = vrot.slane %v2879_v40, %v3140_v17 }
 0x11a   : > { %1557 = vperm.xlu1 %1911, %v2787_v56   ;;  %v2883_v56 = vrot.slane %v2879_v40, %v2035_v12 }
 0x11c   : > { %1561 = vperm.xlu0 %1910, %v2752_v44   ;;  %v1245_v44 = vpop.permute.xlu0 %1244  ;;  %v1277_v9 = vmul.f32 %v2883_v56, %v1200_v24  ;;  %v1278_v16 = vmul.f32 %v2883_v56, %v1205_v51  ;;  %v1280_v45 = vmul.f32 %v2883_v56, %v1215_v35  ;;  %v1282_v62 = vmul.f32 %v2883_v56, %v1225_v61 }
 0x11d   : > { %v1284_v49 = vmul.f32 %v2883_v56, %v1235_v33 }
 0x11e   : > { %1565 = vperm.xlu1 %1911, %v1181_v47   ;;  %v1293_v12 = vadd.f32 %v2896_v7, %v1277_v9  ;;  %v1294_v37 = vadd.f32 %v2896_v7, %v1278_v16  ;;  %v1296_v23 = vadd.f32 %v2896_v7, %v1280_v45  ;;  %v1298_v28 = vadd.f32 %v2896_v7, %v1282_v62 }
 0x11f   : > { %v1300_v41 = vadd.f32 %v2896_v7, %v1284_v49 }
 0x120   : > { %1569 = vperm.xlu0 %1910, %v2810_v10   ;;  %v1286_v10 = vmul.f32 %v2883_v56, %v1245_v44 }
 0x122   : > { %v2877_v15 = vpop.permute.xlu1 %1259  ;;  %v1302_v46 = vadd.f32 %v2896_v7, %v1286_v10 }
 0x12d   : > { %v1255_v3 = vpop.permute.xlu0 %1254 }
 0x12e   : > { %v1288_v34 = vmul.f32 %v2883_v56, %v1255_v3 }
 0x130   : > { %v1304_v39 = vadd.f32 %v2896_v7, %v1288_v34 }
 0x136   : > { %v2885_v53 = vpop.permute.xlu1 %1269 }
 0x13b   : > { %v1314_v25 = vpop.permute.xlu1 %1313 }
 0x13c   : > { %v1377_v32 = vmul.f32 %v2891_v60, %v1314_v25 }
 0x13e   : > { %v2901_v26 = vadd.f32 %v1377_v32, %v1293_v12 }
 0x13f   : > { %v1318_v55 = vpop.permute.xlu1 %1317 }
 0x140   : > { %v1265_v54 = vpop.permute.xlu0 %1264  ;;  %v1378_v14 = vmul.f32 %v2891_v60, %v1318_v55 }
 0x141   : > { %v1290_v18 = vmul.f32 %v2883_v56, %v1265_v54 }
 0x142   : > { %v2906_v22 = vadd.f32 %v1378_v14, %v1294_v37 }
 0x143   : > { %v1326_v6 = vpop.permute.xlu1 %1325  ;;  %v1306_v24 = vadd.f32 %v2896_v7, %v1290_v18  ;;  %v1281_v18 = vmul.f32 %v2883_v56, %v2863_v8 }
 0x144   : > { %v1380_v58 = vmul.f32 %v2891_v60, %v1326_v6 }
 0x145   : > { %v1310_v2 = vpop.permute.xlu0 %1309 }
 0x146   : > { %v2911_v57 = vadd.f32 %v1380_v58, %v1296_v23  ;;  %v3141_v23 = vsub.s32 2, %v2024_v5  ;;  %v1376_v49 = vmul.f32 %v2891_v60, %v1310_v2 }
 0x147   : > { %v1334_v21 = vpop.permute.xlu1 %1333 }
 0x148   : > { %v1382_v42 = vmul.f32 %v2891_v60, %v1334_v21  ;;  %v2965_v62 = vrot.slane %v2879_v40, %v3141_v23  ;;  %v1276_v21 = vmul.f32 %v2883_v56, %v2860_v0 }
 0x149   : > { %v1322_v50 = vpop.permute.xlu0 %1321 }
 0x14a   : > { %v2916_v29 = vadd.f32 %v1382_v42, %v1298_v28  ;;  %v1292_v10 = vadd.f32 %v2896_v7, %v1276_v21  ;;  %v1379_v2 = vmul.f32 %v2891_v60, %v1322_v50  ;;  %v1297_v21 = vadd.f32 %v2896_v7, %v1281_v18 }
 0x14b   : > { %v1342_v43 = vpop.permute.xlu1 %1341 }
 0x14c   : > { %v1384_v52 = vmul.f32 %v2891_v60, %v1342_v43  ;;  %v1392_v34 = vadd.f32 %v1376_v49, %v1292_v10 }
 0x14d   : > { %v2921_v20 = vpop.permute.xlu0 %1329 }
 0x14e   : > { %v2923_v4 = vadd.f32 %v1384_v52, %v1300_v41  ;;  %v1279_v41 = vmul.f32 %v2883_v56, %v2856_v48 }
 0x14f   : > { %v1350_v27 = vpop.permute.xlu1 %1349 }
 0x150   : > { %v1386_v11 = vmul.f32 %v2891_v60, %v1350_v27  ;;  %v3142_v27 = vsub.s32 3, %v2024_v5 }
 0x151   : > { %v2928_v38 = vpop.permute.xlu0 %1337 }
 0x152   : > { %v2930_v59 = vadd.f32 %v1386_v11, %v1302_v46  ;;  %v2985_v0 = vrot.slane %v2879_v40, %v3142_v27 }
 0x153   : > { %v1358_v1 = vpop.permute.xlu1 %1357 }
 0x154   : > { %v1388_v47 = vmul.f32 %v2891_v60, %v1358_v1 }
 0x155   : > { %v2935_v30 = vpop.permute.xlu0 %1345 }
 0x156   : > { %v2937_v63 = vadd.f32 %v1388_v47, %v1304_v39  ;;  %v1295_v39 = vadd.f32 %v2896_v7, %v1279_v41 }
 0x157   : > { %v1366_v51 = vpop.permute.xlu1 %1365 }
 0x158   : > { %v1390_v35 = vmul.f32 %v2891_v60, %v1366_v51 }
 0x159   : > { %v2941_v61 = vpop.permute.xlu0 %1353 }
 0x15a   : > { %v2943_v33 = vadd.f32 %v1390_v35, %v1306_v24  ;;  %v1395_v24 = vadd.f32 %v1379_v2, %v1295_v39 }
 0x15c   : > { %v1410_v36 = vpop.permute.xlu1 %1409 }
 0x15d   : > { %v2945_v44 = vpop.permute.xlu0 %1361  ;;  %v1476_v52 = vmul.f32 %v2965_v62, %v1410_v36 }
 0x15f   : > { %v1492_v47 = vadd.f32 %v1476_v52, %v1392_v34 }
 0x160   : > { %v1418_v9 = vpop.permute.xlu1 %1417 }
 0x161   : > { %v2947_v17 = vpop.permute.xlu0 %1369  ;;  %v1478_v1 = vmul.f32 %v2965_v62, %v1418_v9 }
 0x163   : > { %v1494_v9 = vadd.f32 %v1478_v1, %v2906_v22  ;;  %v1285_v1 = vmul.f32 %v2883_v56, %v2870_v31 }
 0x164   : > { %v1422_v3 = vpop.permute.xlu1 %1421 }
 0x165   : > { %v1479_v40 = vmul.f32 %v2965_v62, %v1422_v3  ;;  %v1283_v3 = vmul.f32 %v2883_v56, %v2867_v13  ;;  %v1383_v13 = vmul.f32 %v2891_v60, %v2928_v38 }
 0x166   : > { %v1414_v25 = vpop.permute.xlu0 %1413 }
 0x167   : > { %v1477_v42 = vmul.f32 %v2965_v62, %v1414_v25 }
 0x168   : > { %v1430_v16 = vpop.permute.xlu1 %1429 }
 0x169   : > { %v1493_v11 = vadd.f32 %v1477_v42, %v2901_v26  ;;  %v1381_v26 = vmul.f32 %v2891_v60, %v2921_v20  ;;  %v1481_v49 = vmul.f32 %v2965_v62, %v1430_v16  ;;  %v1495_v20 = vadd.f32 %v1479_v40, %v1395_v24 }
 0x16a   : > { %v1426_v12 = vpop.permute.xlu0 %1425 }
 0x16b   : > { %v1480_v35 = vmul.f32 %v2965_v62, %v1426_v12  ;;  %v1397_v10 = vadd.f32 %v1381_v26, %v1297_v21  ;;  %v1301_v26 = vadd.f32 %v2896_v7, %v1285_v1 }
 0x16c   : > { %v2949_v32 = vpop.permute.xlu1 %1437 }
 0x16d   : > { %v1496_v16 = vadd.f32 %v1480_v35, %v2911_v57  ;;  %v1483_v57 = vmul.f32 %v2965_v62, %v2949_v32  ;;  %v1287_v35 = vmul.f32 %v2883_v56, %v2872_v19 }
 0x16e   : > { %v1434_v55 = vpop.permute.xlu0 %1433 }
 0x16f   : > { %v1482_v27 = vmul.f32 %v2965_v62, %v1434_v55 }
 0x170   : > { %v2951_v37 = vpop.permute.xlu1 %1445 }
 0x172   : > { %v2953_v45 = vpop.permute.xlu0 %1441 }
 0x173   : > { %v1484_v40 = vmul.f32 %v2965_v62, %v2953_v45 }
 0x174   : > { %v2956_v54 = vpop.permute.xlu1 %1453 }
 0x175   : > { %v1500_v21 = vadd.f32 %v1484_v40, %v2923_v4  ;;  %v1487_v4 = vmul.f32 %v2965_v62, %v2956_v54 }
 0x176   : > { %v2958_v14 = vpop.permute.xlu0 %1449 }
 0x177   : > { %v1486_v19 = vmul.f32 %v2965_v62, %v2958_v14 }
 0x178   : > { %v2960_v6 = vpop.permute.xlu1 %1461 }
 0x17a   : > { %v2967_v58 = vpop.permute.xlu0 %1457 }
 0x17c   : > { %v2971_v28 = vpop.permute.xlu1 %1469 }
 0x17e   : > { %v2975_v43 = vpop.permute.xlu0 %1465 }
 0x181   : > { %v1514_v46 = vpop.permute.xlu1 %1513 }
 0x182   : > { %v1577_v48 = vmul.f32 %v2985_v0, %v1514_v46 }
 0x183   : > { %v1510_v5 = vpop.permute.xlu0 %1509 }
 0x184   : > { %v1576_v50 = vmul.f32 %v2985_v0, %v1510_v5  ;;  %v1593_v51 = vadd.f32 %v1577_v48, %v1493_v11  ;;  %v1299_v11 = vadd.f32 %v2896_v7, %v1283_v3  ;;  %v1497_v48 = vadd.f32 %v1481_v49, %v1397_v10 }
 0x185   : > { %v1518_v36 = vpop.permute.xlu1 %1517 }
 0x186   : > { %v1592_v25 = vadd.f32 %v1576_v50, %v1492_v47  ;;  %v1815_v23 = vpack.c.bf16 %v1593_v51, %v1593_v51  ;;  %v1578_v8 = vmul.f32 %v2985_v0, %v1518_v36  ;;  %v1399_v5 = vadd.f32 %v1383_v13, %v1299_v11 }
 0x187   : > { %v1522_v22 = vpop.permute.xlu0 %1521  ;;  %v1385_v47 = vmul.f32 %v2891_v60, %v2935_v30  ;;  %v1498_v50 = vadd.f32 %v1482_v27, %v2916_v29  ;;  %v1485_v30 = vmul.f32 %v2965_v62, %v2951_v37  ;;  %v1502_v27 = vadd.f32 %v1486_v19, %v2930_v59 }
 0x188   : > { %v1814_v12 = vpack.c.bf16 %v1592_v25, %v1592_v25  ;;  %v1579_v42 = vmul.f32 %v2985_v0, %v1522_v22  ;;  %1674 = vst.msk [vmem:[%s3008_s28 + $0x4] sm:$0xf] %vm1672_vm2, %v1815_v23  ;;  %v1594_v41 = vadd.f32 %v1578_v8, %v1494_v9  ;;  %v1499_v45 = vadd.f32 %v1483_v57, %v1399_v5 }
 0x189   : > { %v1526_v52 = vpop.permute.xlu1 %1525  ;;  %v1401_v23 = vadd.f32 %v1385_v47, %v1301_v26  ;;  %v1387_v8 = vmul.f32 %v2891_v60, %v2941_v61  ;;  %v1291_v11 = vmul.f32 %v2883_v56, %v2885_v53 }
 0x18a   : > { %1673 = vst.msk [vmem:[%s3008_s28] sm:$0xf] %vm1672_vm2, %v1814_v12  ;;  %v1595_v2 = vadd.f32 %v1579_v42, %v1495_v20  ;;  %v1816_v46 = vpack.c.bf16 %v1594_v41, %v1594_v41  ;;  %v1580_v34 = vmul.f32 %v2985_v0, %v1526_v52  ;;  %v1303_v20 = vadd.f32 %v2896_v7, %v1287_v35 }
 0x18b   : > { %v1530_v39 = vpop.permute.xlu0 %1529  ;;  %v1289_v12 = vmul.f32 %v2883_v56, %v2877_v15  ;;  %v1501_v42 = vadd.f32 %v1485_v30, %v1401_v23  ;;  %v1488_v52 = vmul.f32 %v2965_v62, %v2967_v58  ;;  %v1490_v56 = vmul.f32 %v2965_v62, %v2975_v43 }
 0x18c   : > { %v1817_v38 = vpack.c.bf16 %v1595_v2, %v1595_v2  ;;  %v1581_v55 = vmul.f32 %v2985_v0, %v1530_v39  ;;  %1675 = vst.msk [vmem:[%s3008_s28 + $0x8] sm:$0xf] %vm1672_vm2, %v1816_v46  ;;  %v1596_v18 = vadd.f32 %v1580_v34, %v1496_v16  ;;  %v1403_v13 = vadd.f32 %v1387_v8, %v1303_v20 }
 0x18d   : > { %v1534_v31 = vpop.permute.xlu1 %1533  ;;  %v1389_v16 = vmul.f32 %v2891_v60, %v2945_v44  ;;  %v1305_v34 = vadd.f32 %v2896_v7, %v1289_v12  ;;  %v1489_v44 = vmul.f32 %v2965_v62, %v2960_v6  ;;  %v1307_v47 = vadd.f32 %v2896_v7, %v1291_v11 }
 0x18e   : > { %1676 = vst.msk [vmem:[%s3008_s28 + $0xc] sm:$0xf] %vm1672_vm2, %v1817_v38  ;;  %v1597_v32 = vadd.f32 %v1581_v55, %v1497_v48  ;;  %v1818_v51 = vpack.c.bf16 %v1596_v18, %v1596_v18  ;;  %v1582_v24 = vmul.f32 %v2985_v0, %v1534_v31  ;;  %v1503_v58 = vadd.f32 %v1487_v4, %v1403_v13 }
 0x18f   : > { %v1538_v36 = vpop.permute.xlu0 %1537  ;;  %v1405_v57 = vadd.f32 %v1389_v16, %v1305_v34  ;;  %v1391_v38 = vmul.f32 %v2891_v60, %v2947_v17  ;;  %v1504_v55 = vadd.f32 %v1488_v52, %v2937_v63  ;;  %v1491_v60 = vmul.f32 %v2965_v62, %v2971_v28 }
 0x190   : > { %v1819_v9 = vpack.c.bf16 %v1597_v32, %v1597_v32  ;;  %v1583_v29 = vmul.f32 %v2985_v0, %v1538_v36  ;;  %1677 = vst.msk [vmem:[%s3008_s28 + $0x10] sm:$0xf] %vm1672_vm2, %v1818_v51  ;;  %v1598_v25 = vadd.f32 %v1582_v24, %v1498_v50  ;;  %v1506_v51 = vadd.f32 %v1490_v56, %v2943_v33 }
 0x191   : > { %v1542_v3 = vpop.permute.xlu1 %1541  ;;  %v1505_v40 = vadd.f32 %v1489_v44, %v1405_v57  ;;  %v1407_v50 = vadd.f32 %v1391_v38, %v1307_v47 }
 0x192   : > { %1678 = vst.msk [vmem:[%s3008_s28 + $0x14] sm:$0xf] %vm1672_vm2, %v1819_v9  ;;  %v1599_v37 = vadd.f32 %v1583_v29, %v1499_v45  ;;  %v1820_v49 = vpack.c.bf16 %v1598_v25, %v1598_v25  ;;  %v1584_v22 = vmul.f32 %v2985_v0, %v1542_v3 }
 0x193   : > { %v1546_v61 = vpop.permute.xlu0 %1545  ;;  %v1507_v26 = vadd.f32 %v1491_v60, %v1407_v50 }
 0x194   : > { %v1821_v41 = vpack.c.bf16 %v1599_v37, %v1599_v37  ;;  %v1585_v14 = vmul.f32 %v2985_v0, %v1546_v61  ;;  %1679 = vst.msk [vmem:[%s3008_s28 + $0x18] sm:$0xf] %vm1672_vm2, %v1820_v49  ;;  %v1600_v10 = vadd.f32 %v1584_v22, %v1500_v21 }
 0x195   : > { %v1550_v15 = vpop.permute.xlu1 %1549 }
 0x196   : > { %1680 = vst.msk [vmem:[%s3008_s28 + $0x1c] sm:$0xf] %vm1672_vm2, %v1821_v41  ;;  %v1601_v54 = vadd.f32 %v1585_v14, %v1501_v42  ;;  %v1822_v2 = vpack.c.bf16 %v1600_v10, %v1600_v10  ;;  %v1586_v46 = vmul.f32 %v2985_v0, %v1550_v15 }
 0x197   : > { %v1554_v1 = vpop.permute.xlu0 %1553 }
 0x198   : > { %v1823_v48 = vpack.c.bf16 %v1601_v54, %v1601_v54  ;;  %v1587_v59 = vmul.f32 %v2985_v0, %v1554_v1  ;;  %1681 = vst.msk [vmem:[%s3008_s28 + $0x20] sm:$0xf] %vm1672_vm2, %v1822_v2  ;;  %v1602_v39 = vadd.f32 %v1586_v46, %v1502_v27 }
 0x199   : > { %v1558_v18 = vpop.permute.xlu1 %1557 }
 0x19a   : > { %1682 = vst.msk [vmem:[%s3008_s28 + $0x24] sm:$0xf] %vm1672_vm2, %v1823_v48  ;;  %v1603_v53 = vadd.f32 %v1587_v59, %v1503_v58  ;;  %v1824_v6 = vpack.c.bf16 %v1602_v39, %v1602_v39  ;;  %v1588_v5 = vmul.f32 %v2985_v0, %v1558_v18 }
 0x19b   : > { %v1562_v31 = vpop.permute.xlu0 %1561 }
 0x19c   : > { %v1825_v63 = vpack.c.bf16 %v1603_v53, %v1603_v53  ;;  %v1589_v17 = vmul.f32 %v2985_v0, %v1562_v31  ;;  %1683 = vst.msk [vmem:[%s3008_s28 + $0x28] sm:$0xf] %vm1672_vm2, %v1824_v6  ;;  %v1604_v43 = vadd.f32 %v1588_v5, %v1504_v55 }
 0x19d   : > { %v1566_v32 = vpop.permute.xlu1 %1565 }
 0x19e   : > { %1684 = vst.msk [vmem:[%s3008_s28 + $0x2c] sm:$0xf] %vm1672_vm2, %v1825_v63  ;;  %v1605_v7 = vadd.f32 %v1589_v17, %v1505_v40  ;;  %v1826_v24 = vpack.c.bf16 %v1604_v43, %v1604_v43  ;;  %v1590_v62 = vmul.f32 %v2985_v0, %v1566_v32 }
 0x19f   : > { %v1570_v28 = vpop.permute.xlu0 %1569 }
 0x1a0   : > { %v1827_v35 = vpack.c.bf16 %v1605_v7, %v1605_v7  ;;  %v1591_v30 = vmul.f32 %v2985_v0, %v1570_v28  ;;  %1685 = vst.msk [vmem:[%s3008_s28 + $0x30] sm:$0xf] %vm1672_vm2, %v1826_v24  ;;  %v1606_v36 = vadd.f32 %v1590_v62, %v1506_v51 }
 0x1a2   : > { %1686 = vst.msk [vmem:[%s3008_s28 + $0x34] sm:$0xf] %vm1672_vm2, %v1827_v35  ;;  %v1607_v45 = vadd.f32 %v1591_v30, %v1507_v26  ;;  %v1828_v9 = vpack.c.bf16 %v1606_v36, %v1606_v36 }
 0x1a4   : > { %v1829_v33 = vpack.c.bf16 %v1607_v45, %v1607_v45  ;;  %1687 = vst.msk [vmem:[%s3008_s28 + $0x38] sm:$0xf] %vm1672_vm2, %v1828_v9 }
 0x1a6   : > { %1688 = vst.msk [vmem:[%s3008_s28 + $0x3c] sm:$0xf] %vm1672_vm2, %v1829_v33 }
 0x1a7 PF: > { %s14_s19 = sadd.s32 1, %s1950_s19   ;;  %s3143_s15 = smov %s1942_s17 }
 0x1a8   : > { %p11_p7 = scmp.ge.s32.totalorder %s14_s19, 6   ;;  %s3144_s16 = smov %s1946_s18 }
 0x1a9   : > { %s3145_s17 = smov %s3148_s20  ;;  %s3146_s18 = smov %s3152_s21 }
 0x1aa   :  { %13 = sbr.rel (!%p11_p7) target bundleno = 3 (0x3), region = 67 }

</bundles_post_ra>
